<compile_context>
chip_gen: v7x
topology: tpu7x:2x2x1
jax: 0.10.0
libtpu: 0.0.40
codegen_flags: <defaults>
</compile_context>

<pallas_src>
import functools

import jax
import jax.numpy as jnp
from jax.experimental import pallas as pl
from jax.experimental.pallas import tpu as pltpu

BN_EPS = 1e-5
VMEM_LIMIT = 48 << 20   # leave headroom on v7x (64 MiB physical VMEM)


# --------------------------------------------------------------------------
# In-kernel helpers (pure jnp, traced inside kernels)
# --------------------------------------------------------------------------
def _im2col_3x3(x, hout, wout):
    """x: (n, hout+2, wout+2, cin) -> (n*hout*wout, 9*cin) bf16 patch matrix."""
    n = x.shape[0]
    cin = x.shape[3]
    m = n * hout * wout
    cols = []
    for dy in range(3):
        for dx in range(3):
            cols.append(x[:, dy:dy + hout, dx:dx + wout, :].reshape(m, cin))
    return jnp.concatenate(cols, axis=-1)


def _bn_relu(acc, g, be):
    """Training-mode BatchNorm2d over the row (=N*H*W) axis, then ReLU."""
    mean = jnp.mean(acc, axis=0, keepdims=True)
    var = jnp.mean((acc - mean) ** 2, axis=0, keepdims=True)
    acc = (acc - mean) * jax.lax.rsqrt(var + BN_EPS)
    return jnp.maximum(acc * g + be, 0.0)


# --------------------------------------------------------------------------
# Pallas kernels
# --------------------------------------------------------------------------
def _double_conv_kernel(xpad_ref, w1_ref, b1_ref, g1_ref, be1_ref,
                        w2_ref, b2_ref, g2_ref, be2_ref,
                        o_ref, mid_ref):
    """Fused [conv3x3+BN+ReLU] x2.  Grid axis tiles the 2nd conv's cout.

    The first conv's activation (full cmid channels, with a 1px zero halo)
    is computed once at grid step 0 into the persistent VMEM scratch.
    """
    n = o_ref.shape[0]
    hout = o_ref.shape[1]
    wout = o_ref.shape[2]
    ct = o_ref.shape[3]
    cmid = w1_ref.shape[1]

    @pl.when(pl.program_id(0) == 0)
    def _():
        patch1 = _im2col_3x3(xpad_ref[...].astype(jnp.bfloat16), hout, wout)
        acc1 = jnp.dot(patch1, w1_ref[...], preferred_element_type=jnp.float32)
        acc1 = _bn_relu(acc1 + b1_ref[...], g1_ref[...], be1_ref[...])
        mid_ref[...] = jnp.zeros_like(mid_ref)
        mid_ref[:, 1:1 + hout, 1:1 + wout, :] = (
            acc1.reshape(n, hout, wout, cmid).astype(mid_ref.dtype))

    patch2 = _im2col_3x3(mid_ref[...], hout, wout)
    acc2 = jnp.dot(patch2, w2_ref[...], preferred_element_type=jnp.float32)
    acc2 = _bn_relu(acc2 + b2_ref[...], g2_ref[...], be2_ref[...])
    o_ref[...] = acc2.reshape(n, hout, wout, ct)


def _conv3x3_kernel(xpad_ref, w_ref, b_ref, o_ref, *, act):
    """Single 3x3 conv (im2col matmul) + bias + optional activation."""
    n = o_ref.shape[0]
    hout = o_ref.shape[1]
    wout = o_ref.shape[2]
    ct = o_ref.shape[3]
    patch = _im2col_3x3(xpad_ref[...].astype(jnp.bfloat16), hout, wout)
    acc = jnp.dot(patch, w_ref[...], preferred_element_type=jnp.float32)
    acc = acc + b_ref[...]
    if act == "relu":
        acc = jnp.maximum(acc, 0.0)
    elif act == "sigmoid":
        acc = jax.nn.sigmoid(acc)
    o_ref[...] = acc.reshape(n, hout, wout, ct)


def _convT_kernel(xp_ref, w00_ref, w01_ref, w10_ref, w11_ref, b_ref,
                  o00_ref, o01_ref, o10_ref, o11_ref):
    """ConvTranspose2d(k=3,s=2,p=1,op=1) via 4 output-parity phases.

    xp is the input padded by one zero row/col at the bottom/right.
    out[:, 2i+py, 2j+px, :] = phase(py, px)[:, i, j, :]  (interleave in XLA).
    """
    n = o00_ref.shape[0]
    hin = o00_ref.shape[1]
    win = o00_ref.shape[2]
    cout = o00_ref.shape[3]
    cin = xp_ref.shape[3]
    m = n * hin * win

    x = xp_ref[...]
    t00 = x[:, :hin, :win, :].reshape(m, cin)
    t01 = x[:, :hin, 1:win + 1, :].reshape(m, cin)
    t10 = x[:, 1:hin + 1, :win, :].reshape(m, cin)
    t11 = x[:, 1:hin + 1, 1:win + 1, :].reshape(m, cin)
    b = b_ref[...]

    def phase(taps, w_ref):
        acc = jnp.dot(taps, w_ref[...], preferred_element_type=jnp.float32)
        return (acc + b).reshape(n, hin, win, cout)

    o00_ref[...] = phase(t00, w00_ref)
    o01_ref[...] = phase(jnp.concatenate([t00, t01], axis=-1), w01_ref)
    o10_ref[...] = phase(jnp.concatenate([t00, t10], axis=-1), w10_ref)
    o11_ref[...] = phase(jnp.concatenate([t00, t01, t10, t11], axis=-1),
                         w11_ref)


def _maxpool_kernel(x_ref, o_ref):
    """x: (n, ho, 2, wo, 2, c) -> max over the two size-2 window axes."""
    v = x_ref[...]
    v = jnp.max(v, axis=4)          # (n, ho, 2, wo, c)
    o_ref[...] = jnp.max(v, axis=2)  # (n, ho, wo, c)


def _fusion_concat_kernel(a_ref, b_ref, t_ref, o_ref):
    """Fused channel-concat + `fusion` attention block of the reference."""
    img = jnp.concatenate([a_ref[...], b_ref[...]], axis=-1)   # (n,h,w,c)
    t = t_ref[...]                                             # (n,c)
    avg = jnp.mean(jnp.mean(img, axis=1), axis=1)              # AdaptiveAvgPool
    gate = jax.nn.sigmoid(avg * t)
    img = img * gate[:, None, None, :]
    attn = jax.nn.sigmoid(
        jnp.sum(img * t[:, None, None, :], axis=-1, keepdims=True))
    o_ref[...] = img * attn


def _linear_kernel(x_ref, w_ref, b_ref, o_ref):
    x = x_ref[...].astype(jnp.bfloat16)
    o_ref[...] = (jnp.dot(x, w_ref[...], preferred_element_type=jnp.float32)
                  + b_ref[...])


# --------------------------------------------------------------------------
# Wrappers around pallas_call
# --------------------------------------------------------------------------
def double_conv(x, p):
    """Fused conv3x3+BN+ReLU -> conv3x3+BN+ReLU block.  x: NHWC f32."""
    xp = jnp.pad(x, ((0, 0), (1, 1), (1, 1), (0, 0))).astype(jnp.bfloat16)
    n, hp, wp, cin = xp.shape
    h, w = hp - 2, wp - 2
    cmid = p["w1"].shape[1]
    cout = p["w2"].shape[1]
    ct = 512 if cout % 512 == 0 else cout      # tile cout for the deep layers
    grid = (cout // ct,)
    return pl.pallas_call(
        _double_conv_kernel,
        out_shape=jax.ShapeDtypeStruct((n, h, w, cout), jnp.float32),
        grid=grid,
        in_specs=[
            pl.BlockSpec((n, hp, wp, cin), lambda j: (0, 0, 0, 0)),
            pl.BlockSpec((9 * cin, cmid), lambda j: (0, 0)),
            pl.BlockSpec((1, cmid), lambda j: (0, 0)),
            pl.BlockSpec((1, cmid), lambda j: (0, 0)),
            pl.BlockSpec((1, cmid), lambda j: (0, 0)),
            pl.BlockSpec((9 * cmid, ct), lambda j: (0, j)),
            pl.BlockSpec((1, ct), lambda j: (0, j)),
            pl.BlockSpec((1, ct), lambda j: (0, j)),
            pl.BlockSpec((1, ct), lambda j: (0, j)),
        ],
        out_specs=pl.BlockSpec((n, h, w, ct), lambda j: (0, 0, 0, j)),
        scratch_shapes=[pltpu.VMEM((n, h + 2, w + 2, cmid), jnp.bfloat16)],
        compiler_params=pltpu.CompilerParams(
            dimension_semantics=("arbitrary",),
            vmem_limit_bytes=VMEM_LIMIT),
    )(xp, p["w1"], p["b1"], p["g1"], p["be1"],
      p["w2"], p["b2"], p["g2"], p["be2"])


def conv3x3(x, w, b, *, act="none"):
    """Single conv3x3 (+ activation), no BN.  Used for the final conv."""
    xp = jnp.pad(x, ((0, 0), (1, 1), (1, 1), (0, 0))).astype(jnp.bfloat16)
    n, hp, wp, cin = xp.shape
    h, wd = hp - 2, wp - 2
    cout = w.shape[1]
    kernel = functools.partial(_conv3x3_kernel, act=act)
    return pl.pallas_call(
        kernel,
        out_shape=jax.ShapeDtypeStruct((n, h, wd, cout), jnp.float32),
        grid=(1,),
        in_specs=[
            pl.BlockSpec((n, hp, wp, cin), lambda i: (0, 0, 0, 0)),
            pl.BlockSpec((9 * cin, cout), lambda i: (0, 0)),
            pl.BlockSpec((1, cout), lambda i: (0, 0)),
        ],
        out_specs=pl.BlockSpec((n, h, wd, cout), lambda i: (0, 0, 0, 0)),
        compiler_params=pltpu.CompilerParams(
            dimension_semantics=("arbitrary",)),
    )(xp, w, b)


def conv_transpose2x(x, p):
    """ConvTranspose2d(k=3, s=2, p=1, output_pad=1) via phase decomposition."""
    n, h, w, cin = x.shape
    cout = p["p00"].shape[1]
    xp = jnp.pad(x, ((0, 0), (0, 1), (0, 1), (0, 0))).astype(jnp.bfloat16)
    out_blk = pl.BlockSpec((n, h, w, cout), lambda i: (0, 0, 0, 0))
    p00, p01, p10, p11 = pl.pallas_call(
        _convT_kernel,
        out_shape=tuple(jax.ShapeDtypeStruct((n, h, w, cout), jnp.float32)
                        for _ in range(4)),
        grid=(1,),
        in_specs=[
            pl.BlockSpec((n, h + 1, w + 1, cin), lambda i: (0, 0, 0, 0)),
            pl.BlockSpec((cin, cout), lambda i: (0, 0)),
            pl.BlockSpec((2 * cin, cout), lambda i: (0, 0)),
            pl.BlockSpec((2 * cin, cout), lambda i: (0, 0)),
            pl.BlockSpec((4 * cin, cout), lambda i: (0, 0)),
            pl.BlockSpec((1, cout), lambda i: (0, 0)),
        ],
        out_specs=(out_blk, out_blk, out_blk, out_blk),
        compiler_params=pltpu.CompilerParams(
            dimension_semantics=("arbitrary",),
            vmem_limit_bytes=VMEM_LIMIT),
    )(xp, p["p00"], p["p01"], p["p10"], p["p11"], p["b"])
    # Interleave parities: out[:, 2i+py, 2j+px, :] = p{py}{px}[:, i, j, :]
    grid6 = jnp.stack([jnp.stack([p00, p01], axis=3),
                       jnp.stack([p10, p11], axis=3)], axis=2)
    return grid6.reshape(n, 2 * h, 2 * w, cout)


def maxpool2(x):
    n, h, w, c = x.shape
    ho, wo = h // 2, w // 2
    xr = x.reshape(n, ho, 2, wo, 2, c)       # free row-major split in XLA
    return pl.pallas_call(
        _maxpool_kernel,
        out_shape=jax.ShapeDtypeStruct((n, ho, wo, c), jnp.float32),
        grid=(1,),
        in_specs=[pl.BlockSpec((n, ho, 2, wo, 2, c),
                               lambda i: (0, 0, 0, 0, 0, 0))],
        out_specs=pl.BlockSpec((n, ho, wo, c), lambda i: (0, 0, 0, 0)),
    )(xr)


def fusion_concat(a, b, text):
    """cat([a, b], channel) followed by the reference `fusion` attention."""
    n, h, w, c1 = a.shape
    c2 = b.shape[3]
    c = c1 + c2
    return pl.pallas_call(
        _fusion_concat_kernel,
        out_shape=jax.ShapeDtypeStruct((n, h, w, c), jnp.float32),
        grid=(1,),
        in_specs=[
            pl.BlockSpec((n, h, w, c1), lambda i: (0, 0, 0, 0)),
            pl.BlockSpec((n, h, w, c2), lambda i: (0, 0, 0, 0)),
            pl.BlockSpec((n, c), lambda i: (0, 0)),
        ],
        out_specs=pl.BlockSpec((n, h, w, c), lambda i: (0, 0, 0, 0)),
    )(a, b, text)


def linear(x, w, b):
    bsz, cin = x.shape
    cout = w.shape[1]
    return pl.pallas_call(
        _linear_kernel,
        out_shape=jax.ShapeDtypeStruct((bsz, cout), jnp.float32),
        grid=(1,),
        in_specs=[
            pl.BlockSpec((bsz, cin), lambda i: (0, 0)),
            pl.BlockSpec((cin, cout), lambda i: (0, 0)),
            pl.BlockSpec((1, cout), lambda i: (0, 0)),
        ],
        out_specs=pl.BlockSpec((bsz, cout), lambda i: (0, 0)),
    )(x, w, b)


# --------------------------------------------------------------------------
# Parameter construction (deterministic, synthetic)
# --------------------------------------------------------------------------
def _conv_w(key, cin, cout):
    kw, kb = jax.random.split(key)
    std = (2.0 / (cin * 9)) ** 0.5
    w = std * jax.random.normal(kw, (3, 3, cin, cout), jnp.float32)
    b = 0.01 * jax.random.normal(kb, (cout,), jnp.float32)
    return w, b


def _double_conv_params(key, cin, cmid):
    k1, k2 = jax.random.split(key)
    w1, b1 = _conv_w(k1, cin, cmid)
    w2, b2 = _conv_w(k2, cmid, cmid)
    ones = jnp.ones((1, cmid), jnp.float32)
    zeros = jnp.zeros((1, cmid), jnp.float32)
    return dict(
        w1=w1.reshape(9 * cin, cmid).astype(jnp.bfloat16),
        b1=b1.reshape(1, cmid), g1=ones, be1=zeros,
        w2=w2.reshape(9 * cmid, cmid).astype(jnp.bfloat16),
        b2=b2.reshape(1, cmid), g2=ones, be2=zeros)


def _convT_params(key, cin, cout):
    # Synthetic weights -> no PyTorch weight-flip bookkeeping is required.
    w, b = _conv_w(key, cin, cout)
    wb = w.astype(jnp.bfloat16)
    return dict(
        p00=wb[1, 1],
        p01=jnp.concatenate([wb[1, 0], wb[1, 2]], axis=0),
        p10=jnp.concatenate([wb[0, 1], wb[2, 1]], axis=0),
        p11=jnp.concatenate([wb[0, 0], wb[0, 2], wb[2, 0], wb[2, 2]], axis=0),
        b=b.reshape(1, cout))


def _linear_params(key, cin, couts):
    ws, bs = [], []
    for i, co in enumerate(couts):
        kw, kb = jax.random.split(jax.random.fold_in(key, i))
        ws.append((1.0 / cin) ** 0.5 *
                  jax.random.normal(kw, (cin, co), jnp.float32))
        bs.append(0.01 * jax.random.normal(kb, (co,), jnp.float32))
    return (jnp.concatenate(ws, axis=1).astype(jnp.bfloat16),
            jnp.concatenate(bs).reshape(1, -1).astype(jnp.float32))


def init_unet_params(key, in_channel, out_channel, vocab=64, text_dim=512):
    keys = jax.random.split(key, 16)
    p = {}
    p["enc1"] = _double_conv_params(keys[0], in_channel, 64)
    p["enc2"] = _double_conv_params(keys[1], 64, 128)
    p["enc3"] = _double_conv_params(keys[2], 128, 256)
    p["enc4"] = _double_conv_params(keys[3], 256, 512)
    p["enc5"] = _double_conv_params(keys[4], 512, 1024)
    p["bott"] = _convT_params(keys[5], 1024, 512)
    p["dec1"] = _double_conv_params(keys[6], 1024, 512)
    p["dec1_t"] = _convT_params(keys[7], 512, 256)
    p["dec2"] = _double_conv_params(keys[8], 512, 256)
    p["dec2_t"] = _convT_params(keys[9], 256, 128)
    p["dec3"] = _double_conv_params(keys[10], 256, 128)
    p["dec3_t"] = _convT_params(keys[11], 128, 64)
    p["final"] = _double_conv_params(keys[12], 128, 64)
    w3, b3 = _conv_w(keys[13], 64, out_channel)
    p["final_w3"] = w3.reshape(9 * 64, out_channel).astype(jnp.bfloat16)
    p["final_b3"] = b3.reshape(1, out_channel)
    # Linear2/3/5 merged into one (512, 1408) matmul.
    # (Linear1 exists in __init__ but is unused in forward -> skipped.)
    p["lin_w"], p["lin_b"] = _linear_params(keys[14], text_dim,
                                            (128, 256, 1024))
    # TODO(synk): CLIP ViT-B/16 encode_text replaced by a deterministic
    # embedding-mean stand-in; real CLIP weights cannot be loaded here.
    p["text_embed"] = 0.1 * jax.random.normal(keys[15], (vocab, text_dim),
                                              jnp.float32)
    return p


# --------------------------------------------------------------------------
# Forward pass
# --------------------------------------------------------------------------
def unet_forward(params, x_nchw, text_tokens):
    # NCHW (PyTorch) -> NHWC (kernel layout)
    x = jnp.transpose(x_nchw, (0, 2, 3, 1)).astype(jnp.float32)

    # text conditioning (CLIP stand-in) + the three Linears as one matmul
    cond = jnp.mean(jnp.take(params["text_embed"], text_tokens, axis=0),
                    axis=1)                                   # (B, 512)
    cond_all = linear(cond, params["lin_w"], params["lin_b"])  # (B, 1408)
    cond2 = cond_all[:, 0:128]
    cond3 = cond_all[:, 128:384]
    cond5 = cond_all[:, 384:1408]

    # encoder
    e1 = double_conv(x, params["enc1"])
    e2 = double_conv(maxpool2(e1), params["enc2"])
    e3 = double_conv(maxpool2(e2), params["enc3"])
    e4 = double_conv(maxpool2(e3), params["enc4"])
    e5 = double_conv(maxpool2(e4), params["enc5"])

    # bottleneck + decoder
    bott = conv_transpose2x(e5, params["bott"])

    cat1 = fusion_concat(bott, e4, cond5)
    d1 = conv_transpose2x(double_conv(cat1, params["dec1"]), params["dec1_t"])

    cat2 = fusion_concat(d1, e3, cond)
    d2 = conv_transpose2x(double_conv(cat2, params["dec2"]), params["dec2_t"])

    cat3 = fusion_concat(d2, e2, cond3)
    d3 = conv_transpose2x(double_conv(cat3, params["dec3"]), params["dec3_t"])

    cat4 = fusion_concat(d3, e1, cond2)
    f = double_conv(cat4, params["final"])
    f = conv3x3(f, params["final_w3"], params["final_b3"], act="sigmoid")

    # NHWC -> NCHW for the caller
    return jnp.transpose(f, (0, 3, 1, 2))


# --------------------------------------------------------------------------
# Main
# --------------------------------------------------------------------------
if __name__ == "__main__":
    key = jax.random.PRNGKey(0)
    k_param, k_x, k_tok = jax.random.split(key, 3)

    B, IN_C, OUT_C, S = 2, 4, 3, 16          # spatial 16 -> 8 -> 4 -> 2 -> 1
    params = init_unet_params(k_param, IN_C, OUT_C)

    x = jax.random.normal(k_x, (B, IN_C, S, S), jnp.float32)        # NCHW
    text_tokens = jax.random.randint(k_tok, (B, 8), 0, 64, jnp.int32)

    out = unet_forward(params, x, text_tokens)
    out = jax.block_until_ready(out)

    assert out.shape == (B, OUT_C, S, S), out.shape
    assert bool(jnp.all(jnp.isfinite(out)))
    assert bool(jnp.all((out >= 0.0) & (out <= 1.0)))   # final sigmoid range
    print("KERNEL_OK")
</pallas_src>

<mosaic_0001>
module attributes {stable_mosaic.version = 11 : i64} {
  func.func @_linear_kernel(%arg0: i32, %arg1: memref<2x512xf32, #tpu.memory_space<vmem>>, %arg2: memref<512x1408xbf16, #tpu.memory_space<vmem>>, %arg3: memref<1x1408xf32, #tpu.memory_space<vmem>>, %arg4: memref<2x1408xf32, #tpu.memory_space<vmem>>) attributes {dimension_semantics = [#tpu.dimension_semantics<arbitrary>], iteration_bounds = array<i64: 1>, scalar_prefetch = 0 : i64, scratch_operands = 0 : i64, tpu.core_type = #tpu.core_type<tc>, window_params = [{pipeline_mode = #tpu.pipeline_mode<synchronous>, transform_indices = @transform_0, window_bounds = array<i64: 2, 512>}, {pipeline_mode = #tpu.pipeline_mode<synchronous>, transform_indices = @transform_1, window_bounds = array<i64: 512, 1408>}, {pipeline_mode = #tpu.pipeline_mode<synchronous>, transform_indices = @transform_2, window_bounds = array<i64: 1, 1408>}, {pipeline_mode = #tpu.pipeline_mode<synchronous>, transform_indices = @transform_3, window_bounds = array<i64: 2, 1408>}]} {
    %c0 = arith.constant 0 : index
    %c0_0 = arith.constant 0 : index
    %0 = vector.load %arg1[%c0, %c0_0] : memref<2x512xf32, #tpu.memory_space<vmem>>, vector<2x512xf32>
    %1 = arith.truncf %0 : vector<2x512xf32> to vector<2x512xbf16>
    %c0_1 = arith.constant 0 : index
    %c0_2 = arith.constant 0 : index
    %2 = vector.load %arg2[%c0_1, %c0_2] : memref<512x1408xbf16, #tpu.memory_space<vmem>>, vector<512x1408xbf16>
    %cst = arith.constant dense<0.000000e+00> : vector<2x1408xf32>
    %3 = tpu.matmul %1, %2, %cst {dimension_numbers = #tpu.dot_dimension_numbers<[1], [0], [0], [1], [0, 0, 1, 1], [], []>} : vector<2x512xbf16>, vector<512x1408xbf16>, vector<2x1408xf32> -> vector<2x1408xf32>
    %c0_3 = arith.constant 0 : index
    %c0_4 = arith.constant 0 : index
    %4 = vector.load %arg3[%c0_3, %c0_4] : memref<1x1408xf32, #tpu.memory_space<vmem>>, vector<1x1408xf32>
    %5 = vector.broadcast %4 : vector<1x1408xf32> to vector<2x1408xf32>
    %6 = arith.addf %3, %5 : vector<2x1408xf32>
    %c0_5 = arith.constant 0 : index
    %c0_6 = arith.constant 0 : index
    %7 = vector.load %arg4[%c0_5, %c0_6] : memref<2x1408xf32, #tpu.memory_space<vmem>>, vector<2x1408xf32>
    tpu.vector_store %arg4[%c0_5, %c0_6], %6 {strides = array<i32>} : memref<2x1408xf32, #tpu.memory_space<vmem>>, vector<2x1408xf32>,
    return
  }
  func.func @transform_0(%arg0: i32) -> (i32, i32) {
    %c0_i32 = arith.constant 0 : i32
    %c0_i32_0 = arith.constant 0 : i32
    %c0_i32_1 = arith.constant 0 : i32
    return %c0_i32, %c0_i32_0 : i32, i32
  }
  func.func @transform_1(%arg0: i32) -> (i32, i32) {
    %c0_i32 = arith.constant 0 : i32
    %c0_i32_0 = arith.constant 0 : i32
    %c0_i32_1 = arith.constant 0 : i32
    return %c0_i32, %c0_i32_0 : i32, i32
  }
  func.func @transform_2(%arg0: i32) -> (i32, i32) {
    %c0_i32 = arith.constant 0 : i32
    %c0_i32_0 = arith.constant 0 : i32
    %c0_i32_1 = arith.constant 0 : i32
    return %c0_i32, %c0_i32_0 : i32, i32
  }
  func.func @transform_3(%arg0: i32) -> (i32, i32) {
    %c0_i32 = arith.constant 0 : i32
    %c0_i32_0 = arith.constant 0 : i32
    %c0_i32_1 = arith.constant 0 : i32
    return %c0_i32, %c0_i32_0 : i32, i32
  }
}

</mosaic_0001>

<bundles_post_ra>
// kernel: tpu_custom_call.1
= control target key start
LH: loop header
LB: loop body
LE: loop exit
PB: predicated region body
PF: predicated region fallthrough
CT: control target
= control target key end

     0   :  { %8 = vsyncpa [#allocation3], 0  ;;  %s4084_s0 = inlined_call_operand.hbm [shape: f32[2,512], index: 0, kind: input, shape index: {}]   ;;  %s4085_s1 = inlined_call_operand.hbm [shape: bf16[512,1408], index: 1, kind: input, shape index: {}]   ;;  %s4086_s2 = inlined_call_operand.hbm [shape: f32[1,1408], index: 2, kind: input, shape index: {}]   ;;  %s4087_s3 = inlined_call_operand.hbm [shape: f32[2,1408], index: 3, kind: output, shape index: {}]  }
   0x1   :  { %9 = vsyncpa [#allocation6], 0 }
   0x2   :  { %10 = vsyncpa [#allocation4], 0  ;;  %s3928_s12 = smov [#allocation5]   ;;  %s3834_s16 = scalar_lea.hbm %s4085_s1, 45056 }
   0x3   :  { %s26_s13 = sshll.u32 %s3928_s12, 4  ;;  %p3835_p0 = scmp.ne.s32.totalorder %s4085_s1, %s3834_s16  ;;  %s27_s13 = int_to_ptr.vmem [resolvable:$true] %s26_s13 }
   0x4   :  { %p3838_p1 = scmp.lt.u32.totalorder %s3834_s16, %s4085_s1 }
   0x6   :  { %p3840_p2 = pnand %p3838_p1, %p3835_p0 }
   0x8   :  { %3843 = shalt.err (!%p3840_p2)
}
   0x9   :  { %s3844_s21 = scalar_lea.vmem %s27_s13, 45056  ;;  %p3849_p4 = scmp.lt.s32.totalorder %s27_s13, %s27_s13 }
   0xa   :  { %p3845_p3 = scmp.ne.s32.totalorder %s27_s13, %s3844_s21  ;;  %p3850_p5 = scmp.lt.s32.totalorder %s3844_s21, %s3844_s21 }
   0xc   :  { %p3851_p6 = por %p3850_p5, %p3849_p4 }
   0xe   :  { %p3852_p7 = pnand %p3851_p6, %p3845_p3 }
  0x10   :  { %3855 = shalt.err (!%p3852_p7)
}
  0x11   :  { %s3929_s22 = smov 704   ;;  %s3930_s23 = smov 44  }
  0x12   :  { %32 = dma.hbm_to_vmem [thread:$0]  %s4085_s1, 45056, %s27_s13, [#allocation6], %s3929_s22, %s3929_s22, %s3930_s23  }
  0x13   :  { %s3931_s26 = smov [#allocation2]   ;;  %s3932_s28 = smov [#allocation7]  }
  0x14   :  { %s17_s27 = sshll.u32 %s3931_s26, 4  ;;  %s39_s29 = sshll.u32 %s3932_s28, 4  ;;  %s18_s27 = int_to_ptr.vmem [resolvable:$true] %s17_s27  ;;  %s40_s29 = int_to_ptr.vmem [resolvable:$true] %s39_s29 }
  0x15   :  { %s3856_s5 = scalar_lea.hbm %s4084_s0, 128 }
  0x16   :  { %p3857_p8 = scmp.ne.s32.totalorder %s4084_s0, %s3856_s5  ;;  %p3860_p9 = scmp.lt.u32.totalorder %s3856_s5, %s4084_s0 }
  0x18   :  { %p3862_p10 = pnand %p3860_p9, %p3857_p8 }
  0x1a   :  { %3865 = shalt.err (!%p3862_p10)
}
  0x1b   :  { %s3866_s1 = scalar_lea.vmem %s18_s27, 128  ;;  %p3871_p12 = scmp.lt.s32.totalorder %s18_s27, %s18_s27 }
  0x1c   :  { %p3867_p11 = scmp.ne.s32.totalorder %s18_s27, %s3866_s1  ;;  %p3872_p13 = scmp.lt.s32.totalorder %s3866_s1, %s3866_s1 }
  0x1e   :  { %p3873_p0 = por %p3872_p13, %p3871_p12 }
  0x20   :  { %p3874_p1 = pnand %p3873_p0, %p3867_p11 }
  0x22   :  { %3877 = shalt.err (!%p3874_p1)
}
  0x23   :  { %20 = dma.hbm_to_vmem [thread:$0]  %s4084_s0, 128, %s18_s27, [#allocation3]  }
  0x24   :  { %s3878_s14 = scalar_lea.hbm %s4086_s2, 176 }
  0x25   :  { %p3879_p2 = scmp.ne.s32.totalorder %s4086_s2, %s3878_s14  ;;  %p3882_p3 = scmp.lt.u32.totalorder %s3878_s14, %s4086_s2 }
  0x27   :  { %p3884_p4 = pnand %p3882_p3, %p3879_p2 }
  0x29   :  { %3887 = shalt.err (!%p3884_p4)
}
  0x2a   :  { %s3888_s19 = scalar_lea.vmem %s40_s29, 176  ;;  %s3892_s20 = scalar_lea.vmem %s40_s29, 192 }
  0x2b   :  { %p3889_p5 = scmp.ne.s32.totalorder %s40_s29, %s3888_s19  ;;  %p3893_p6 = scmp.lt.s32.totalorder %s40_s29, %s40_s29 }
  0x2c   :  { %p3894_p7 = scmp.lt.s32.totalorder %s3892_s20, %s3888_s19 }
  0x2e   :  { %p3895_p8 = por %p3894_p7, %p3893_p6 }
  0x30   :  { %p3896_p9 = pnand %p3895_p8, %p3889_p5 }
  0x32   :  { %3899 = shalt.err (!%p3896_p9)
}
  0x33   :  { %42 = dma.hbm_to_vmem [thread:$0]  %s4086_s2, 176, %s40_s29, [#allocation6]  }
  0x34   :  { %3922 = dma.done.wait [#allocation3], 128  }
  0x35   :  { %3923 = vsyncadd [#allocation3], 4294967168 }
  0x36   :  { %3924 = dma.done.wait [#allocation6], 45232  }
  0x37   :  { %3925 = vsyncadd [#allocation6], 4294922064  ;;  %v3321_v0 = vld [vmem:[#allocation5 + $0x4] ss:$44 sps:$4 sm:$0xff]   ;;  %v3323_v1 = vld [vmem:[#allocation5 + $0xc] ss:$44 sps:$4 sm:$0xff]   ;;  %v59_v38 = vlaneseq }
  0x38   :  { %2315 = vmatprep.subr.bf16.mxu0 %v3321_v0  ;;  %v3325_v2 = vld [vmem:[#allocation5] ss:$44 sps:$4 sm:$0xff]   ;;  %v3326_v3 = vld [vmem:[#allocation5 + $0x8] ss:$44 sps:$4 sm:$0xff]   ;;  %2397 = vmatprep.subr.bf16.mxu1 %v3323_v1  ;;  %v3329_v5 = vld [vmem:[#allocation5 + $0x64] ss:$44 sps:$4 sm:$0xff]  }
  0x39   :  { %v3327_v4 = vld [vmem:[#allocation5 + $0x5c] ss:$44 sps:$4 sm:$0xff]   ;;  %2316 = vmatpush1.bf16.msra.mxu0 %v3325_v2  ;;  %2398 = vmatpush1.bf16.msra.mxu1 %v3326_v3  ;;  %v3331_v6 = vld [vmem:[#allocation5 + $0x58] ss:$44 sps:$4 sm:$0xff]   ;;  %v3332_v7 = vld [vmem:[#allocation5 + $0x60] ss:$44 sps:$4 sm:$0xff]  }
  0x3a   :  { %2317 = vmatprep.subr.bf16.mxu0 %v3327_v4  ;;  %2399 = vmatprep.subr.bf16.mxu1 %v3329_v5  ;;  %v3333_v8 = vld [vmem:[#allocation5 + $0xb4] ss:$44 sps:$4 sm:$0xff]   ;;  %v3335_v9 = vld [vmem:[#allocation5 + $0xbc] ss:$44 sps:$4 sm:$0xff]   ;;  %v3338_v11 = vld [vmem:[#allocation5 + $0xb8] ss:$44 sps:$4 sm:$0xff]  }
  0x3b   :  { %v3337_v10 = vld [vmem:[#allocation5 + $0xb0] ss:$44 sps:$4 sm:$0xff]   ;;  %v3339_v12 = vld [vmem:[#allocation5 + $0x10c] ss:$44 sps:$4 sm:$0xff]   ;;  %v3341_v13 = vld [vmem:[#allocation5 + $0x114] ss:$44 sps:$4 sm:$0xff]  }
  0x3c   :  { %v3343_v14 = vld [vmem:[#allocation5 + $0x108] ss:$44 sps:$4 sm:$0xff]   ;;  %v3344_v15 = vld [vmem:[#allocation5 + $0x110] ss:$44 sps:$4 sm:$0xff]   ;;  %v3347_v17 = vld [vmem:[#allocation5 + $0x16c] ss:$44 sps:$4 sm:$0xff]  }
  0x3d   :  { %2318 = vmatpush1.bf16.msra.mxu0 %v3331_v6  ;;  %2400 = vmatpush1.bf16.msra.mxu1 %v3332_v7  ;;  %v3345_v16 = vld [vmem:[#allocation5 + $0x164] ss:$44 sps:$4 sm:$0xff]   ;;  %v3349_v18 = vld [vmem:[#allocation5 + $0x160] ss:$44 sps:$4 sm:$0xff]   ;;  %v3350_v19 = vld [vmem:[#allocation5 + $0x168] ss:$44 sps:$4 sm:$0xff]  }
  0x3e   :  { %2319 = vmatprep.subr.bf16.mxu0 %v3333_v8  ;;  %2401 = vmatprep.subr.bf16.mxu1 %v3335_v9  ;;  %v3351_v20 = vld [vmem:[#allocation5 + $0x1bc] ss:$44 sps:$4 sm:$0xff]   ;;  %v3353_v21 = vld [vmem:[#allocation5 + $0x1c4] ss:$44 sps:$4 sm:$0xff]   ;;  %v3356_v23 = vld [vmem:[#allocation5 + $0x1c0] ss:$44 sps:$4 sm:$0xff]  }
  0x3f   :  { %v3355_v22 = vld [vmem:[#allocation5 + $0x1b8] ss:$44 sps:$4 sm:$0xff]   ;;  %v3357_v24 = vld [vmem:[#allocation5 + $0x214] ss:$44 sps:$4 sm:$0xff]   ;;  %v3359_v25 = vld [vmem:[#allocation5 + $0x21c] ss:$44 sps:$4 sm:$0xff]  }
  0x40   :  { %v3361_v26 = vld [vmem:[#allocation5 + $0x210] ss:$44 sps:$4 sm:$0xff]   ;;  %v3362_v27 = vld [vmem:[#allocation5 + $0x218] ss:$44 sps:$4 sm:$0xff]   ;;  %v3365_v29 = vld [vmem:[#allocation5 + $0x274] ss:$44 sps:$4 sm:$0xff]  }
  0x41   :  { %2320 = vmatpush1.bf16.msra.mxu0 %v3337_v10  ;;  %2402 = vmatpush1.bf16.msra.mxu1 %v3338_v11  ;;  %v3363_v28 = vld [vmem:[#allocation5 + $0x26c] ss:$44 sps:$4 sm:$0xff]   ;;  %v3367_v30 = vld [vmem:[#allocation5 + $0x268] ss:$44 sps:$4 sm:$0xff]   ;;  %v3368_v31 = vld [vmem:[#allocation5 + $0x270] ss:$44 sps:$4 sm:$0xff]  }
  0x42   :  { %2321 = vmatprep.subr.bf16.mxu0 %v3339_v12  ;;  %2403 = vmatprep.subr.bf16.mxu1 %v3341_v13  ;;  %v3369_v32 = vld [vmem:[#allocation5 + $0x2c4] ss:$44 sps:$4 sm:$0xff]   ;;  %v3371_v33 = vld [vmem:[#allocation5 + $0x2cc] ss:$44 sps:$4 sm:$0xff]   ;;  %v3374_v35 = vld [vmem:[#allocation5 + $0x2c8] ss:$44 sps:$4 sm:$0xff]  }
  0x43   :  { %v3373_v34 = vld [vmem:[#allocation5 + $0x2c0] ss:$44 sps:$4 sm:$0xff]   ;;  %v3933_v36 = vmov 1983009808   ;;  %v3375_v39 = vld [vmem:[#allocation5 + $0x31c] ss:$44 sps:$4 sm:$0xff]  }
  0x44   :  { %v57_v37 = vunpack.c.l.s4 %v3933_v36  ;;  %v3377_v40 = vld [vmem:[#allocation5 + $0x324] ss:$44 sps:$4 sm:$0xff]   ;;  %v3991_v43 = vshrl.u32 %v59_v38, 7  ;;  %v3380_v44 = vld [vmem:[#allocation5 + $0x320] ss:$44 sps:$4 sm:$0xff]   ;;  %v53_v52 = vld [vmem:[#allocation2] sm:$0xff] }
  0x45   :  { %2322 = vmatpush1.bf16.msra.mxu0 %v3343_v14  ;;  %2404 = vmatpush1.bf16.msra.mxu1 %v3344_v15  ;;  %v3379_v41 = vld [vmem:[#allocation5 + $0x318] ss:$44 sps:$4 sm:$0xff]   ;;  %v3381_v45 = vld [vmem:[#allocation5 + $0x374] ss:$44 sps:$4 sm:$0xff]   ;;  %v3383_v46 = vld [vmem:[#allocation5 + $0x37c] ss:$44 sps:$4 sm:$0xff]   ;;  %v55_v4 = vcombine.high %v53_v52, %v53_v52 }
  0x46   :  { %2323 = vmatprep.subr.bf16.mxu0 %v3345_v16  ;;  %2405 = vmatprep.subr.bf16.mxu1 %v3347_v17  ;;  %v58_v42 = vunpack.c.0.s8 %v57_v37  ;;  %v3385_v47 = vld [vmem:[#allocation5 + $0x370] ss:$44 sps:$4 sm:$0xff]   ;;  %v3386_v48 = vld [vmem:[#allocation5 + $0x378] ss:$44 sps:$4 sm:$0xff]   ;;  %v3389_v51 = vld [vmem:[#allocation5 + $0x3d4] ss:$44 sps:$4 sm:$0xff]  }
  0x47   :  { %v3387_v50 = vld [vmem:[#allocation5 + $0x3cc] ss:$44 sps:$4 sm:$0xff]   ;;  %v3391_v53 = vld [vmem:[#allocation5 + $0x3c8] ss:$44 sps:$4 sm:$0xff]   ;;  %v3392_v55 = vld [vmem:[#allocation5 + $0x3d0] ss:$44 sps:$4 sm:$0xff]  }
  0x48   :  { %v3994_v49 = vsub.s32 %v58_v42, %v3991_v43  ;;  %v3393_v56 = vld [vmem:[#allocation5 + $0x424] ss:$44 sps:$4 sm:$0xff]   ;;  %v3395_v57 = vld [vmem:[#allocation5 + $0x42c] ss:$44 sps:$4 sm:$0xff]   ;;  %v3398_v61 = vld [vmem:[#allocation5 + $0x428] ss:$44 sps:$4 sm:$0xff]  }
  0x49   :  { %2324 = vmatpush1.bf16.msra.mxu0 %v3349_v18  ;;  %2406 = vmatpush1.bf16.msra.mxu1 %v3350_v19  ;;  %v3397_v59 = vld [vmem:[#allocation5 + $0x420] ss:$44 sps:$4 sm:$0xff]   ;;  %v3399_v62 = vld [vmem:[#allocation5 + $0x47c] ss:$44 sps:$4 sm:$0xff]   ;;  %v3401_v63 = vld [vmem:[#allocation5 + $0x484] ss:$44 sps:$4 sm:$0xff]  }
  0x4a   :  { %2325 = vmatprep.subr.bf16.mxu0 %v3351_v20  ;;  %2407 = vmatprep.subr.bf16.mxu1 %v3353_v21  ;;  %v62_v54 = vrot.slane %v53_v52, %v3994_v49  ;;  %v3403_v0 = vld [vmem:[#allocation5 + $0x478] ss:$44 sps:$4 sm:$0xff]   ;;  %v3404_v1 = vld [vmem:[#allocation5 + $0x480] ss:$44 sps:$4 sm:$0xff]   ;;  %v3407_v3 = vld [vmem:[#allocation5 + $0x4dc] ss:$44 sps:$4 sm:$0xff]   ;;  %v4002_v9 = vrot.slane %v55_v4, %v3994_v49 }
  0x4b   :  { %v3405_v2 = vld [vmem:[#allocation5 + $0x4d4] ss:$44 sps:$4 sm:$0xff]   ;;  %v3409_v5 = vld [vmem:[#allocation5 + $0x4d0] ss:$44 sps:$4 sm:$0xff]   ;;  %v3410_v6 = vld [vmem:[#allocation5 + $0x4d8] ss:$44 sps:$4 sm:$0xff]  }
  0x4c   :  { %v70_v58 = vcombine.high %v62_v54, %v62_v54  ;;  %v3411_v7 = vld [vmem:[#allocation5 + $0x52c] ss:$44 sps:$4 sm:$0xff]   ;;  %v3413_v8 = vld [vmem:[#allocation5 + $0x534] ss:$44 sps:$4 sm:$0xff]   ;;  %v3416_v11 = vld [vmem:[#allocation5 + $0x530] ss:$44 sps:$4 sm:$0xff]   ;;  %v71_v14 = vcombine.high %v4002_v9, %v4002_v9  ;;  %v4006_v16 = vpack.c.bf16 %v62_v54, %v62_v54 }
  0x4d   :  { %2326 = vmatpush1.bf16.msra.mxu0 %v3355_v22  ;;  %2408 = vmatpush1.bf16.msra.mxu1 %v3356_v23  ;;  %v3415_v10 = vld [vmem:[#allocation5 + $0x528] ss:$44 sps:$4 sm:$0xff]   ;;  %v3419_v12 = vld [vmem:[#allocation5 + $0x584] ss:$44 sps:$4 sm:$0xff]   ;;  %v3422_v13 = vld [vmem:[#allocation5 + $0x58c] ss:$44 sps:$4 sm:$0xff]  }
  0x4e   :  { %2327 = vmatprep.subr.bf16.mxu0 %v3357_v24  ;;  %2409 = vmatprep.subr.bf16.mxu1 %v3359_v25  ;;  %v3997_v60 = vpack.c.bf16 %v70_v58, %v70_v58  ;;  %v3417_v15 = vld [vmem:[#allocation5 + $0x580] ss:$44 sps:$4 sm:$0xff]   ;;  %v3420_v17 = vld [vmem:[#allocation5 + $0x588] ss:$44 sps:$4 sm:$0xff]   ;;  %v3428_v19 = vld [vmem:[#allocation5 + $0x5e4] ss:$44 sps:$4 sm:$0xff]   ;;  %v4008_v20 = vpack.c.bf16 %v71_v14, %v71_v14 }
  0x4f   :  { %v3425_v18 = vld [vmem:[#allocation5 + $0x5dc] ss:$44 sps:$4 sm:$0xff]   ;;  %v3423_v21 = vld [vmem:[#allocation5 + $0x5d8] ss:$44 sps:$4 sm:$0xff]   ;;  %v3426_v22 = vld [vmem:[#allocation5 + $0x5e0] ss:$44 sps:$4 sm:$0xff]  }
  0x50   :  { %2347 = vmatprep.mubr.bf16.mxu0 %v3997_v60  ;;  %2429 = vmatprep.mubr.bf16.mxu1 %v3997_v60  ;;  %v3431_v23 = vld [vmem:[#allocation5 + $0x634] ss:$44 sps:$4 sm:$0xff]   ;;  %v3434_v24 = vld [vmem:[#allocation5 + $0x63c] ss:$44 sps:$4 sm:$0xff]   ;;  %v3452_v36 = vld [vmem:[#allocation5 + $0x744] ss:$44 sps:$4 sm:$0xff]  }
  0x51   :  { %2328 = vmatpush1.bf16.msra.mxu0 %v3361_v26  ;;  %2410 = vmatpush1.bf16.msra.mxu1 %v3362_v27  ;;  %v3429_v25 = vld [vmem:[#allocation5 + $0x630] ss:$44 sps:$4 sm:$0xff]   ;;  %v3432_v26 = vld [vmem:[#allocation5 + $0x638] ss:$44 sps:$4 sm:$0xff]   ;;  %v3450_v38 = vld [vmem:[#allocation5 + $0x740] ss:$44 sps:$4 sm:$0xff]  }
  0x52   :  { %2329 = vmatprep.subr.bf16.mxu0 %v3363_v28  ;;  %2411 = vmatprep.subr.bf16.mxu1 %v3365_v29  ;;  %v3437_v27 = vld [vmem:[#allocation5 + $0x68c] ss:$44 sps:$4 sm:$0xff]   ;;  %v3440_v28 = vld [vmem:[#allocation5 + $0x694] ss:$44 sps:$4 sm:$0xff]   ;;  %v3476_v54 = vld [vmem:[#allocation5 + $0x8a4] ss:$44 sps:$4 sm:$0xff]  }
  0x53   :  { %v3435_v29 = vld [vmem:[#allocation5 + $0x688] ss:$44 sps:$4 sm:$0xff]   ;;  %v3447_v37 = vld [vmem:[#allocation5 + $0x738] ss:$44 sps:$4 sm:$0xff]   ;;  %v3489_v4 = vld [vmem:[#allocation5 + $0x9a0] ss:$44 sps:$4 sm:$0xff]  }
  0x54   :  { %v3456_v42 = vld [vmem:[#allocation5 + $0x798] ss:$44 sps:$4 sm:$0xff]   ;;  %v3468_v52 = vld [vmem:[#allocation5 + $0x848] ss:$44 sps:$4 sm:$0xff]   ;;  %s3934_s2 = smov [#allocation8]  }
  0x55   :  { %2330 = vmatpush1.bf16.msra.mxu0 %v3367_v30  ;;  %2412 = vmatpush1.bf16.msra.mxu1 %v3368_v31  ;;  %v3438_v30 = vld [vmem:[#allocation5 + $0x690] ss:$44 sps:$4 sm:$0xff]   ;;  %v3504_v14 = vld [vmem:[#allocation5 + $0xa58] ss:$44 sps:$4 sm:$0xff]   ;;  %s2878_s22 = sshll.u32 %s3934_s2, 4  ;;  %s2879_s22 = int_to_ptr.vmem [resolvable:$true] %s2878_s22 }
  0x56   :  { %2331 = vmatprep.subr.bf16.mxu0 %v3369_v32  ;;  %2413 = vmatprep.subr.bf16.mxu1 %v3371_v33  ;;  %v3443_v31 = vld [vmem:[#allocation5 + $0x6e4] ss:$44 sps:$4 sm:$0xff]   ;;  %v3446_v32 = vld [vmem:[#allocation5 + $0x6ec] ss:$44 sps:$4 sm:$0xff]   ;;  %v3482_v58 = vld [vmem:[#allocation5 + $0x8fc] ss:$44 sps:$4 sm:$0xff]   ;;  %p3905_p11 = scmp.lt.s32.totalorder %s2879_s22, %s2879_s22 }
  0x57   :  { %v3441_v33 = vld [vmem:[#allocation5 + $0x6e0] ss:$44 sps:$4 sm:$0xff]   ;;  %s3900_s23 = scalar_lea.vmem %s2879_s22, 352 }
  0x58   :  { %p3901_p10 = scmp.ne.s32.totalorder %s2879_s22, %s3900_s23  ;;  %p3906_p12 = scmp.lt.s32.totalorder %s3900_s23, %s3900_s23 }
  0x59   :  { %2332 = vmatpush1.bf16.msra.mxu0 %v3373_v34  ;;  %2414 = vmatpush1.bf16.msra.mxu1 %v3374_v35  ;;  %v3444_v34 = vld [vmem:[#allocation5 + $0x6e8] ss:$44 sps:$4 sm:$0xff]  }
  0x5a   :  { %2333 = vmatprep.subr.bf16.mxu0 %v3375_v39  ;;  %2415 = vmatprep.subr.bf16.mxu1 %v3377_v40  ;;  %v3449_v35 = vld [vmem:[#allocation5 + $0x73c] ss:$44 sps:$4 sm:$0xff]   ;;  %v3455_v39 = vld [vmem:[#allocation5 + $0x794] ss:$44 sps:$4 sm:$0xff]   ;;  %p3907_p13 = por %p3906_p12, %p3905_p11 }
  0x5b   :  { %v3458_v40 = vld [vmem:[#allocation5 + $0x79c] ss:$44 sps:$4 sm:$0xff]  }
  0x5c   :  { %p3908_p0 = pnand %p3907_p13, %p3901_p10 }
  0x5d   :  { %2334 = vmatpush1.bf16.msra.mxu0 %v3379_v41  ;;  %2416 = vmatpush1.bf16.msra.mxu1 %v3380_v44  ;;  %v3453_v41 = vld [vmem:[#allocation5 + $0x790] ss:$44 sps:$4 sm:$0xff]   ;;  %v3461_v44 = vld [vmem:[#allocation5 + $0x7ec] ss:$44 sps:$4 sm:$0xff]  }
  0x5e   :  { %2335 = vmatprep.subr.bf16.mxu0 %v3381_v45  ;;  %2417 = vmatprep.subr.bf16.mxu1 %v3383_v46  ;;  %v3464_v45 = vld [vmem:[#allocation5 + $0x7f4] ss:$44 sps:$4 sm:$0xff]  }
  0x5f   :  { %v3459_v46 = vld [vmem:[#allocation5 + $0x7e8] ss:$44 sps:$4 sm:$0xff]  }
  0x61   :  { %2336 = vmatpush1.bf16.msra.mxu0 %v3385_v47  ;;  %2418 = vmatpush1.bf16.msra.mxu1 %v3386_v48  ;;  %v3462_v47 = vld [vmem:[#allocation5 + $0x7f0] ss:$44 sps:$4 sm:$0xff]  }
  0x62   :  { %2337 = vmatprep.subr.bf16.mxu0 %v3387_v50  ;;  %2419 = vmatprep.subr.bf16.mxu1 %v3389_v51  ;;  %v3467_v48 = vld [vmem:[#allocation5 + $0x844] ss:$44 sps:$4 sm:$0xff]   ;;  %v3470_v50 = vld [vmem:[#allocation5 + $0x84c] ss:$44 sps:$4 sm:$0xff]  }
  0x63   :  { %v3465_v51 = vld [vmem:[#allocation5 + $0x840] ss:$44 sps:$4 sm:$0xff]  }
  0x65   :  { %2338 = vmatpush1.bf16.msra.mxu0 %v3391_v53  ;;  %2420 = vmatpush1.bf16.msra.mxu1 %v3392_v55  ;;  %v3473_v53 = vld [vmem:[#allocation5 + $0x89c] ss:$44 sps:$4 sm:$0xff]   ;;  %v3471_v55 = vld [vmem:[#allocation5 + $0x898] ss:$44 sps:$4 sm:$0xff]  }
  0x66   :  { %2339 = vmatprep.subr.bf16.mxu0 %v3393_v56  ;;  %2421 = vmatprep.subr.bf16.mxu1 %v3395_v57  ;;  %v3474_v56 = vld [vmem:[#allocation5 + $0x8a0] ss:$44 sps:$4 sm:$0xff]  }
  0x67   :  { %v3479_v57 = vld [vmem:[#allocation5 + $0x8f4] ss:$44 sps:$4 sm:$0xff]  }
  0x69   :  { %2340 = vmatpush1.bf16.msra.mxu0 %v3397_v59  ;;  %2422 = vmatpush1.bf16.msra.mxu1 %v3398_v61  ;;  %v3477_v59 = vld [vmem:[#allocation5 + $0x8f0] ss:$44 sps:$4 sm:$0xff]   ;;  %v3480_v61 = vld [vmem:[#allocation5 + $0x8f8] ss:$44 sps:$4 sm:$0xff]  }
  0x6a   :  { %2341 = vmatprep.subr.bf16.mxu0 %v3399_v62  ;;  %2423 = vmatprep.subr.bf16.mxu1 %v3401_v63  ;;  %v3485_v62 = vld [vmem:[#allocation5 + $0x94c] ss:$44 sps:$4 sm:$0xff]   ;;  %v3488_v63 = vld [vmem:[#allocation5 + $0x954] ss:$44 sps:$4 sm:$0xff]  }
  0x6d   :  { %2342 = vmatpush1.bf16.msra.mxu0 %v3403_v0  ;;  %2424 = vmatpush1.bf16.msra.mxu1 %v3404_v1  ;;  %v3483_v0 = vld [vmem:[#allocation5 + $0x948] ss:$44 sps:$4 sm:$0xff]   ;;  %v3486_v1 = vld [vmem:[#allocation5 + $0x950] ss:$44 sps:$4 sm:$0xff]  }
  0x6e   :  { %2343 = vmatprep.subr.bf16.mxu0 %v3405_v2  ;;  %2425 = vmatprep.subr.bf16.mxu1 %v3407_v3  ;;  %v3491_v2 = vld [vmem:[#allocation5 + $0x9a4] ss:$44 sps:$4 sm:$0xff]   ;;  %v3494_v3 = vld [vmem:[#allocation5 + $0x9ac] ss:$44 sps:$4 sm:$0xff]  }
  0x71   :  { %2344 = vmatpush1.bf16.msra.mxu0 %v3409_v5  ;;  %2426 = vmatpush1.bf16.msra.mxu1 %v3410_v6  ;;  %v3492_v5 = vld [vmem:[#allocation5 + $0x9a8] ss:$44 sps:$4 sm:$0xff]  }
  0x72   :  { %2345 = vmatprep.subr.bf16.mxu0 %v3411_v7  ;;  %2427 = vmatprep.subr.bf16.mxu1 %v3413_v8  ;;  %v3497_v6 = vld [vmem:[#allocation5 + $0x9fc] ss:$44 sps:$4 sm:$0xff]   ;;  %v3500_v7 = vld [vmem:[#allocation5 + $0xa04] ss:$44 sps:$4 sm:$0xff]  }
  0x73   :  { %v3495_v8 = vld [vmem:[#allocation5 + $0x9f8] ss:$44 sps:$4 sm:$0xff]  }
  0x75   :  { %2346 = vmatpush1.bf16.msra.mxu0 %v3415_v10  ;;  %2428 = vmatpush1.bf16.msra.mxu1 %v3416_v11  ;;  %v3498_v10 = vld [vmem:[#allocation5 + $0xa00] ss:$44 sps:$4 sm:$0xff]  }
  0x76   :  { %2356 = vmatprep.subr.bf16.mxu0 %v3419_v12  ;;  %2438 = vmatprep.subr.bf16.mxu1 %v3422_v13  ;;  %v3503_v11 = vld [vmem:[#allocation5 + $0xa54] ss:$44 sps:$4 sm:$0xff]   ;;  %v3506_v12 = vld [vmem:[#allocation5 + $0xa5c] ss:$44 sps:$4 sm:$0xff]  }
  0x77   :  { %v3501_v13 = vld [vmem:[#allocation5 + $0xa50] ss:$44 sps:$4 sm:$0xff]  }
  0x78   :  { %2348 = vmatmul.mubr.bf16.vlgmr.msra.gmra.mrb[0].mxu0 %v4006_v16  ;;  %2430 = vmatmul.mubr.bf16.vlgmr.msra.gmra.mrb[0].mxu1 %v4006_v16 }
  0x79   :  { %2357 = vmatpush1.bf16.msra.mxu0 %v3417_v15  ;;  %2439 = vmatpush1.bf16.msra.mxu1 %v3420_v17  ;;  %v3509_v15 = vld [vmem:[#allocation5 + $0xaac] ss:$44 sps:$4 sm:$0xff]   ;;  %v3512_v17 = vld [vmem:[#allocation5 + $0xab4] ss:$44 sps:$4 sm:$0xff]  }
  0x7a   :  { %2358 = vmatprep.subr.bf16.mxu0 %v3425_v18  ;;  %2440 = vmatprep.subr.bf16.mxu1 %v3428_v19  ;;  %v3507_v18 = vld [vmem:[#allocation5 + $0xaa8] ss:$44 sps:$4 sm:$0xff]   ;;  %v3510_v19 = vld [vmem:[#allocation5 + $0xab0] ss:$44 sps:$4 sm:$0xff]  }
  0x7b   :  { %2388 = vmatprep.mubr.bf16.mxu0 %v4008_v20  ;;  %2470 = vmatprep.mubr.bf16.mxu1 %v4008_v20 }
  0x7d   :  { %2359 = vmatpush1.bf16.msra.mxu0 %v3423_v21  ;;  %2441 = vmatpush1.bf16.msra.mxu1 %v3426_v22  ;;  %v3516_v21 = vld [vmem:[#allocation5 + $0x14] ss:$44 sps:$4 sm:$0xff]   ;;  %v3519_v22 = vld [vmem:[#allocation5 + $0x1c] ss:$44 sps:$4 sm:$0xff]  }
  0x7e   :  { %2360 = vmatprep.subr.bf16.mxu0 %v3431_v23  ;;  %2442 = vmatprep.subr.bf16.mxu1 %v3434_v24  ;;  %v4016_v23 = vpack.c.bf16 %v4002_v9, %v4002_v9  ;;  %v3514_v24 = vld [vmem:[#allocation5 + $0x10] ss:$44 sps:$4 sm:$0xff]  }
  0x7f   :  { %v3528_v9 = vld [vmem:[#allocation5 + $0xc4] ss:$44 sps:$4 sm:$0xff]  }
  0x81   :  { %2361 = vmatpush1.bf16.msra.mxu0 %v3429_v25  ;;  %2443 = vmatpush1.bf16.msra.mxu1 %v3432_v26  ;;  %v3517_v25 = vld [vmem:[#allocation5 + $0x18] ss:$44 sps:$4 sm:$0xff]  }
  0x82   :  { %2362 = vmatprep.subr.bf16.mxu0 %v3437_v27  ;;  %2444 = vmatprep.subr.bf16.mxu1 %v3440_v28  ;;  %v3522_v26 = vld [vmem:[#allocation5 + $0x6c] ss:$44 sps:$4 sm:$0xff]   ;;  %v3525_v27 = vld [vmem:[#allocation5 + $0x74] ss:$44 sps:$4 sm:$0xff]  }
  0x83   :  { %v3520_v28 = vld [vmem:[#allocation5 + $0x68] ss:$44 sps:$4 sm:$0xff]  }
  0x85   :  { %2363 = vmatpush1.bf16.msra.mxu0 %v3435_v29  ;;  %2445 = vmatpush1.bf16.msra.mxu1 %v3438_v30  ;;  %v3523_v29 = vld [vmem:[#allocation5 + $0x70] ss:$44 sps:$4 sm:$0xff]   ;;  %v3531_v30 = vld [vmem:[#allocation5 + $0xcc] ss:$44 sps:$4 sm:$0xff]  }
  0x86   :  { %2364 = vmatprep.subr.bf16.mxu0 %v3443_v31  ;;  %2446 = vmatprep.subr.bf16.mxu1 %v3446_v32  ;;  %v3526_v31 = vld [vmem:[#allocation5 + $0xc0] ss:$44 sps:$4 sm:$0xff]   ;;  %v3529_v32 = vld [vmem:[#allocation5 + $0xc8] ss:$44 sps:$4 sm:$0xff]  }
  0x89   :  { %2365 = vmatpush1.bf16.msra.mxu0 %v3441_v33  ;;  %2447 = vmatpush1.bf16.msra.mxu1 %v3444_v34  ;;  %v3534_v33 = vld [vmem:[#allocation5 + $0x11c] ss:$44 sps:$4 sm:$0xff]   ;;  %v3537_v34 = vld [vmem:[#allocation5 + $0x124] ss:$44 sps:$4 sm:$0xff]  }
  0x8a   :  { %2366 = vmatprep.subr.bf16.mxu0 %v3449_v35  ;;  %2448 = vmatprep.subr.bf16.mxu1 %v3452_v36  ;;  %v3532_v35 = vld [vmem:[#allocation5 + $0x118] ss:$44 sps:$4 sm:$0xff]   ;;  %v3535_v36 = vld [vmem:[#allocation5 + $0x120] ss:$44 sps:$4 sm:$0xff]  }
  0x8d   :  { %2367 = vmatpush1.bf16.msra.mxu0 %v3447_v37  ;;  %2449 = vmatpush1.bf16.msra.mxu1 %v3450_v38  ;;  %v3540_v37 = vld [vmem:[#allocation5 + $0x174] ss:$44 sps:$4 sm:$0xff]   ;;  %v3543_v38 = vld [vmem:[#allocation5 + $0x17c] ss:$44 sps:$4 sm:$0xff]  }
  0x8e   :  { %2368 = vmatprep.subr.bf16.mxu0 %v3455_v39  ;;  %2450 = vmatprep.subr.bf16.mxu1 %v3458_v40  ;;  %v3538_v39 = vld [vmem:[#allocation5 + $0x170] ss:$44 sps:$4 sm:$0xff]   ;;  %v3541_v40 = vld [vmem:[#allocation5 + $0x178] ss:$44 sps:$4 sm:$0xff]  }
  0x91   :  { %2369 = vmatpush1.bf16.msra.mxu0 %v3453_v41  ;;  %2451 = vmatpush1.bf16.msra.mxu1 %v3456_v42  ;;  %v3546_v41 = vld [vmem:[#allocation5 + $0x1cc] ss:$44 sps:$4 sm:$0xff]   ;;  %v3549_v42 = vld [vmem:[#allocation5 + $0x1d4] ss:$44 sps:$4 sm:$0xff]  }
  0x92   :  { %2370 = vmatprep.subr.bf16.mxu0 %v3461_v44  ;;  %2452 = vmatprep.subr.bf16.mxu1 %v3464_v45  ;;  %v3544_v44 = vld [vmem:[#allocation5 + $0x1c8] ss:$44 sps:$4 sm:$0xff]   ;;  %v3547_v45 = vld [vmem:[#allocation5 + $0x1d0] ss:$44 sps:$4 sm:$0xff]  }
  0x95   :  { %2371 = vmatpush1.bf16.msra.mxu0 %v3459_v46  ;;  %2453 = vmatpush1.bf16.msra.mxu1 %v3462_v47  ;;  %v3552_v46 = vld [vmem:[#allocation5 + $0x224] ss:$44 sps:$4 sm:$0xff]   ;;  %v3555_v47 = vld [vmem:[#allocation5 + $0x22c] ss:$44 sps:$4 sm:$0xff]  }
  0x96   :  { %2372 = vmatprep.subr.bf16.mxu0 %v3467_v48  ;;  %2454 = vmatprep.subr.bf16.mxu1 %v3470_v50  ;;  %v3550_v48 = vld [vmem:[#allocation5 + $0x220] ss:$44 sps:$4 sm:$0xff]   ;;  %v3553_v50 = vld [vmem:[#allocation5 + $0x228] ss:$44 sps:$4 sm:$0xff]  }
  0x99   :  { %2373 = vmatpush1.bf16.msra.mxu0 %v3465_v51  ;;  %2455 = vmatpush1.bf16.msra.mxu1 %v3468_v52  ;;  %v3558_v51 = vld [vmem:[#allocation5 + $0x27c] ss:$44 sps:$4 sm:$0xff]   ;;  %v3561_v52 = vld [vmem:[#allocation5 + $0x284] ss:$44 sps:$4 sm:$0xff]  }
  0x9a   :  { %2374 = vmatprep.subr.bf16.mxu0 %v3473_v53  ;;  %2456 = vmatprep.subr.bf16.mxu1 %v3476_v54  ;;  %v3556_v53 = vld [vmem:[#allocation5 + $0x278] ss:$44 sps:$4 sm:$0xff]   ;;  %v3559_v54 = vld [vmem:[#allocation5 + $0x280] ss:$44 sps:$4 sm:$0xff]  }
  0x9d   :  { %2375 = vmatpush1.bf16.msra.mxu0 %v3471_v55  ;;  %2457 = vmatpush1.bf16.msra.mxu1 %v3474_v56  ;;  %v3564_v55 = vld [vmem:[#allocation5 + $0x2d4] ss:$44 sps:$4 sm:$0xff]   ;;  %v3567_v56 = vld [vmem:[#allocation5 + $0x2dc] ss:$44 sps:$4 sm:$0xff]  }
  0x9e   :  { %2376 = vmatprep.subr.bf16.mxu0 %v3479_v57  ;;  %2458 = vmatprep.subr.bf16.mxu1 %v3482_v58  ;;  %v3562_v57 = vld [vmem:[#allocation5 + $0x2d0] ss:$44 sps:$4 sm:$0xff]   ;;  %v3565_v58 = vld [vmem:[#allocation5 + $0x2d8] ss:$44 sps:$4 sm:$0xff]  }
  0xa1   :  { %2377 = vmatpush1.bf16.msra.mxu0 %v3477_v59  ;;  %2459 = vmatpush1.bf16.msra.mxu1 %v3480_v61  ;;  %v3570_v59 = vld [vmem:[#allocation5 + $0x32c] ss:$44 sps:$4 sm:$0xff]   ;;  %v3573_v61 = vld [vmem:[#allocation5 + $0x334] ss:$44 sps:$4 sm:$0xff]  }
  0xa2   :  { %2378 = vmatprep.subr.bf16.mxu0 %v3485_v62  ;;  %2460 = vmatprep.subr.bf16.mxu1 %v3488_v63  ;;  %v3568_v62 = vld [vmem:[#allocation5 + $0x328] ss:$44 sps:$4 sm:$0xff]   ;;  %v3571_v63 = vld [vmem:[#allocation5 + $0x330] ss:$44 sps:$4 sm:$0xff]  }
  0xa5   :  { %2379 = vmatpush1.bf16.msra.mxu0 %v3483_v0  ;;  %2461 = vmatpush1.bf16.msra.mxu1 %v3486_v1  ;;  %v3576_v0 = vld [vmem:[#allocation5 + $0x384] ss:$44 sps:$4 sm:$0xff]   ;;  %v3579_v1 = vld [vmem:[#allocation5 + $0x38c] ss:$44 sps:$4 sm:$0xff]  }
  0xa6   :  { %2380 = vmatprep.subr.bf16.mxu0 %v3491_v2  ;;  %2462 = vmatprep.subr.bf16.mxu1 %v3494_v3  ;;  %v3574_v2 = vld [vmem:[#allocation5 + $0x380] ss:$44 sps:$4 sm:$0xff]   ;;  %v3577_v3 = vld [vmem:[#allocation5 + $0x388] ss:$44 sps:$4 sm:$0xff]  }
  0xa9   :  { %2381 = vmatpush1.bf16.msra.mxu0 %v3489_v4  ;;  %2463 = vmatpush1.bf16.msra.mxu1 %v3492_v5  ;;  %v3582_v4 = vld [vmem:[#allocation5 + $0x3dc] ss:$44 sps:$4 sm:$0xff]   ;;  %v3585_v5 = vld [vmem:[#allocation5 + $0x3e4] ss:$44 sps:$4 sm:$0xff]  }
  0xaa   :  { %2382 = vmatprep.subr.bf16.mxu0 %v3497_v6  ;;  %2464 = vmatprep.subr.bf16.mxu1 %v3500_v7  ;;  %v3580_v6 = vld [vmem:[#allocation5 + $0x3d8] ss:$44 sps:$4 sm:$0xff]   ;;  %v3583_v7 = vld [vmem:[#allocation5 + $0x3e0] ss:$44 sps:$4 sm:$0xff]  }
  0xad   :  { %2383 = vmatpush1.bf16.msra.mxu0 %v3495_v8  ;;  %2465 = vmatpush1.bf16.msra.mxu1 %v3498_v10  ;;  %v3588_v8 = vld [vmem:[#allocation5 + $0x434] ss:$44 sps:$4 sm:$0xff]   ;;  %v3591_v10 = vld [vmem:[#allocation5 + $0x43c] ss:$44 sps:$4 sm:$0xff]  }
  0xae   :  { %2384 = vmatprep.subr.bf16.mxu0 %v3503_v11  ;;  %2466 = vmatprep.subr.bf16.mxu1 %v3506_v12  ;;  %v3586_v11 = vld [vmem:[#allocation5 + $0x430] ss:$44 sps:$4 sm:$0xff]   ;;  %v3589_v12 = vld [vmem:[#allocation5 + $0x438] ss:$44 sps:$4 sm:$0xff]  }
  0xb1   :  { %2385 = vmatpush1.bf16.msra.mxu0 %v3501_v13  ;;  %2467 = vmatpush1.bf16.msra.mxu1 %v3504_v14  ;;  %v3594_v13 = vld [vmem:[#allocation5 + $0x48c] ss:$44 sps:$4 sm:$0xff]   ;;  %v3597_v14 = vld [vmem:[#allocation5 + $0x494] ss:$44 sps:$4 sm:$0xff]  }
  0xb2   :  { %2386 = vmatprep.subr.bf16.mxu0 %v3509_v15  ;;  %2468 = vmatprep.subr.bf16.mxu1 %v3512_v17  ;;  %v3592_v15 = vld [vmem:[#allocation5 + $0x488] ss:$44 sps:$4 sm:$0xff]   ;;  %v3595_v17 = vld [vmem:[#allocation5 + $0x490] ss:$44 sps:$4 sm:$0xff]  }
  0xb5   :  { %2387 = vmatpush1.bf16.msra.mxu0 %v3507_v18  ;;  %2469 = vmatpush1.bf16.msra.mxu1 %v3510_v19  ;;  %v3600_v18 = vld [vmem:[#allocation5 + $0x4e4] ss:$44 sps:$4 sm:$0xff]   ;;  %v3603_v19 = vld [vmem:[#allocation5 + $0x4ec] ss:$44 sps:$4 sm:$0xff]  }
  0xb6   :  { %2479 = vmatprep.subr.bf16.mxu0 %v3516_v21  ;;  %2561 = vmatprep.subr.bf16.mxu1 %v3519_v22  ;;  %v3598_v21 = vld [vmem:[#allocation5 + $0x4e0] ss:$44 sps:$4 sm:$0xff]   ;;  %v3601_v22 = vld [vmem:[#allocation5 + $0x4e8] ss:$44 sps:$4 sm:$0xff]  }
  0xb8   :  { %2389 = vmatmul.mubr.bf16.vlgmr.msra.gmra.mrb[0].mxu0 %v4016_v23  ;;  %2471 = vmatmul.mubr.bf16.vlgmr.msra.gmra.mrb[0].mxu1 %v4016_v23 }
  0xb9   :  { %2480 = vmatpush1.bf16.msra.mxu0 %v3514_v24  ;;  %2562 = vmatpush1.bf16.msra.mxu1 %v3517_v25  ;;  %v3606_v24 = vld [vmem:[#allocation5 + $0x53c] ss:$44 sps:$4 sm:$0xff]   ;;  %v3609_v25 = vld [vmem:[#allocation5 + $0x544] ss:$44 sps:$4 sm:$0xff]  }
  0xba   :  { %2481 = vmatprep.subr.bf16.mxu0 %v3522_v26  ;;  %2563 = vmatprep.subr.bf16.mxu1 %v3525_v27  ;;  %v3604_v26 = vld [vmem:[#allocation5 + $0x538] ss:$44 sps:$4 sm:$0xff]   ;;  %v3607_v27 = vld [vmem:[#allocation5 + $0x540] ss:$44 sps:$4 sm:$0xff]  }
  0xbb   :  { %2511 = vmatprep.mubr.bf16.mxu0 %v3997_v60  ;;  %2593 = vmatprep.mubr.bf16.mxu1 %v3997_v60 }
  0xbd   :  { %2482 = vmatpush1.bf16.msra.mxu0 %v3520_v28  ;;  %2564 = vmatpush1.bf16.msra.mxu1 %v3523_v29  ;;  %v3612_v28 = vld [vmem:[#allocation5 + $0x594] ss:$44 sps:$4 sm:$0xff]   ;;  %v3615_v29 = vld [vmem:[#allocation5 + $0x59c] ss:$44 sps:$4 sm:$0xff]  }
  0xbe   :  { %2483 = vmatprep.subr.bf16.mxu0 %v3528_v9  ;;  %2565 = vmatprep.subr.bf16.mxu1 %v3531_v30  ;;  %v3610_v9 = vld [vmem:[#allocation5 + $0x590] ss:$44 sps:$4 sm:$0xff]   ;;  %v3613_v30 = vld [vmem:[#allocation5 + $0x598] ss:$44 sps:$4 sm:$0xff]  }
  0xc1   :  { %2484 = vmatpush1.bf16.msra.mxu0 %v3526_v31  ;;  %2566 = vmatpush1.bf16.msra.mxu1 %v3529_v32  ;;  %v3618_v31 = vld [vmem:[#allocation5 + $0x5ec] ss:$44 sps:$4 sm:$0xff]   ;;  %v3621_v32 = vld [vmem:[#allocation5 + $0x5f4] ss:$44 sps:$4 sm:$0xff]  }
  0xc2   :  { %2485 = vmatprep.subr.bf16.mxu0 %v3534_v33  ;;  %2567 = vmatprep.subr.bf16.mxu1 %v3537_v34  ;;  %v3616_v33 = vld [vmem:[#allocation5 + $0x5e8] ss:$44 sps:$4 sm:$0xff]   ;;  %v3619_v34 = vld [vmem:[#allocation5 + $0x5f0] ss:$44 sps:$4 sm:$0xff]  }
  0xc5   :  { %2486 = vmatpush1.bf16.msra.mxu0 %v3532_v35  ;;  %2568 = vmatpush1.bf16.msra.mxu1 %v3535_v36  ;;  %v3624_v35 = vld [vmem:[#allocation5 + $0x644] ss:$44 sps:$4 sm:$0xff]   ;;  %v3627_v36 = vld [vmem:[#allocation5 + $0x64c] ss:$44 sps:$4 sm:$0xff]  }
  0xc6   :  { %2487 = vmatprep.subr.bf16.mxu0 %v3540_v37  ;;  %2569 = vmatprep.subr.bf16.mxu1 %v3543_v38  ;;  %v3622_v37 = vld [vmem:[#allocation5 + $0x640] ss:$44 sps:$4 sm:$0xff]   ;;  %v3625_v38 = vld [vmem:[#allocation5 + $0x648] ss:$44 sps:$4 sm:$0xff]  }
  0xc9   :  { %2488 = vmatpush1.bf16.msra.mxu0 %v3538_v39  ;;  %2570 = vmatpush1.bf16.msra.mxu1 %v3541_v40  ;;  %v3630_v39 = vld [vmem:[#allocation5 + $0x69c] ss:$44 sps:$4 sm:$0xff]   ;;  %v3633_v40 = vld [vmem:[#allocation5 + $0x6a4] ss:$44 sps:$4 sm:$0xff]  }
  0xca   :  { %2489 = vmatprep.subr.bf16.mxu0 %v3546_v41  ;;  %2571 = vmatprep.subr.bf16.mxu1 %v3549_v42  ;;  %v3628_v41 = vld [vmem:[#allocation5 + $0x698] ss:$44 sps:$4 sm:$0xff]   ;;  %v3631_v42 = vld [vmem:[#allocation5 + $0x6a0] ss:$44 sps:$4 sm:$0xff]  }
  0xcd   :  { %2490 = vmatpush1.bf16.msra.mxu0 %v3544_v44  ;;  %2572 = vmatpush1.bf16.msra.mxu1 %v3547_v45  ;;  %v3636_v44 = vld [vmem:[#allocation5 + $0x6f4] ss:$44 sps:$4 sm:$0xff]   ;;  %v3639_v45 = vld [vmem:[#allocation5 + $0x6fc] ss:$44 sps:$4 sm:$0xff]  }
  0xce   :  { %2491 = vmatprep.subr.bf16.mxu0 %v3552_v46  ;;  %2573 = vmatprep.subr.bf16.mxu1 %v3555_v47  ;;  %v3634_v46 = vld [vmem:[#allocation5 + $0x6f0] ss:$44 sps:$4 sm:$0xff]   ;;  %v3637_v47 = vld [vmem:[#allocation5 + $0x6f8] ss:$44 sps:$4 sm:$0xff]  }
  0xd1   :  { %2492 = vmatpush1.bf16.msra.mxu0 %v3550_v48  ;;  %2574 = vmatpush1.bf16.msra.mxu1 %v3553_v50  ;;  %v3642_v48 = vld [vmem:[#allocation5 + $0x74c] ss:$44 sps:$4 sm:$0xff]   ;;  %v3645_v50 = vld [vmem:[#allocation5 + $0x754] ss:$44 sps:$4 sm:$0xff]  }
  0xd2   :  { %2493 = vmatprep.subr.bf16.mxu0 %v3558_v51  ;;  %2575 = vmatprep.subr.bf16.mxu1 %v3561_v52  ;;  %v3640_v51 = vld [vmem:[#allocation5 + $0x748] ss:$44 sps:$4 sm:$0xff]   ;;  %v3643_v52 = vld [vmem:[#allocation5 + $0x750] ss:$44 sps:$4 sm:$0xff]  }
  0xd5   :  { %2494 = vmatpush1.bf16.msra.mxu0 %v3556_v53  ;;  %2576 = vmatpush1.bf16.msra.mxu1 %v3559_v54  ;;  %v3648_v53 = vld [vmem:[#allocation5 + $0x7a4] ss:$44 sps:$4 sm:$0xff]   ;;  %v3651_v54 = vld [vmem:[#allocation5 + $0x7ac] ss:$44 sps:$4 sm:$0xff]  }
  0xd6   :  { %2495 = vmatprep.subr.bf16.mxu0 %v3564_v55  ;;  %2577 = vmatprep.subr.bf16.mxu1 %v3567_v56  ;;  %v3646_v55 = vld [vmem:[#allocation5 + $0x7a0] ss:$44 sps:$4 sm:$0xff]   ;;  %v3649_v56 = vld [vmem:[#allocation5 + $0x7a8] ss:$44 sps:$4 sm:$0xff]  }
  0xd9   :  { %2496 = vmatpush1.bf16.msra.mxu0 %v3562_v57  ;;  %2578 = vmatpush1.bf16.msra.mxu1 %v3565_v58  ;;  %v3654_v57 = vld [vmem:[#allocation5 + $0x7fc] ss:$44 sps:$4 sm:$0xff]   ;;  %v3657_v58 = vld [vmem:[#allocation5 + $0x804] ss:$44 sps:$4 sm:$0xff]  }
  0xda   :  { %2497 = vmatprep.subr.bf16.mxu0 %v3570_v59  ;;  %2579 = vmatprep.subr.bf16.mxu1 %v3573_v61  ;;  %v3652_v59 = vld [vmem:[#allocation5 + $0x7f8] ss:$44 sps:$4 sm:$0xff]   ;;  %v3655_v61 = vld [vmem:[#allocation5 + $0x800] ss:$44 sps:$4 sm:$0xff]  }
  0xdd   :  { %2498 = vmatpush1.bf16.msra.mxu0 %v3568_v62  ;;  %2580 = vmatpush1.bf16.msra.mxu1 %v3571_v63  ;;  %v3660_v62 = vld [vmem:[#allocation5 + $0x854] ss:$44 sps:$4 sm:$0xff]   ;;  %v3663_v63 = vld [vmem:[#allocation5 + $0x85c] ss:$44 sps:$4 sm:$0xff]  }
  0xde   :  { %2499 = vmatprep.subr.bf16.mxu0 %v3576_v0  ;;  %2581 = vmatprep.subr.bf16.mxu1 %v3579_v1  ;;  %v3658_v0 = vld [vmem:[#allocation5 + $0x850] ss:$44 sps:$4 sm:$0xff]   ;;  %v3661_v1 = vld [vmem:[#allocation5 + $0x858] ss:$44 sps:$4 sm:$0xff]  }
  0xe1   :  { %2500 = vmatpush1.bf16.msra.mxu0 %v3574_v2  ;;  %2582 = vmatpush1.bf16.msra.mxu1 %v3577_v3  ;;  %v3666_v2 = vld [vmem:[#allocation5 + $0x8ac] ss:$44 sps:$4 sm:$0xff]   ;;  %v3669_v3 = vld [vmem:[#allocation5 + $0x8b4] ss:$44 sps:$4 sm:$0xff]  }
  0xe2   :  { %2501 = vmatprep.subr.bf16.mxu0 %v3582_v4  ;;  %2583 = vmatprep.subr.bf16.mxu1 %v3585_v5  ;;  %v3664_v4 = vld [vmem:[#allocation5 + $0x8a8] ss:$44 sps:$4 sm:$0xff]   ;;  %v3667_v5 = vld [vmem:[#allocation5 + $0x8b0] ss:$44 sps:$4 sm:$0xff]  }
  0xe5   :  { %2502 = vmatpush1.bf16.msra.mxu0 %v3580_v6  ;;  %2584 = vmatpush1.bf16.msra.mxu1 %v3583_v7  ;;  %v3672_v6 = vld [vmem:[#allocation5 + $0x904] ss:$44 sps:$4 sm:$0xff]   ;;  %v3675_v7 = vld [vmem:[#allocation5 + $0x90c] ss:$44 sps:$4 sm:$0xff]  }
  0xe6   :  { %2503 = vmatprep.subr.bf16.mxu0 %v3588_v8  ;;  %2585 = vmatprep.subr.bf16.mxu1 %v3591_v10  ;;  %v3670_v8 = vld [vmem:[#allocation5 + $0x900] ss:$44 sps:$4 sm:$0xff]   ;;  %v3673_v10 = vld [vmem:[#allocation5 + $0x908] ss:$44 sps:$4 sm:$0xff]  }
  0xe9   :  { %2504 = vmatpush1.bf16.msra.mxu0 %v3586_v11  ;;  %2586 = vmatpush1.bf16.msra.mxu1 %v3589_v12  ;;  %v3678_v11 = vld [vmem:[#allocation5 + $0x95c] ss:$44 sps:$4 sm:$0xff]   ;;  %v3681_v12 = vld [vmem:[#allocation5 + $0x964] ss:$44 sps:$4 sm:$0xff]  }
  0xea   :  { %2505 = vmatprep.subr.bf16.mxu0 %v3594_v13  ;;  %2587 = vmatprep.subr.bf16.mxu1 %v3597_v14  ;;  %v3676_v13 = vld [vmem:[#allocation5 + $0x958] ss:$44 sps:$4 sm:$0xff]   ;;  %v3679_v14 = vld [vmem:[#allocation5 + $0x960] ss:$44 sps:$4 sm:$0xff]  }
  0xed   :  { %2506 = vmatpush1.bf16.msra.mxu0 %v3592_v15  ;;  %2588 = vmatpush1.bf16.msra.mxu1 %v3595_v17  ;;  %v3684_v15 = vld [vmem:[#allocation5 + $0x9b4] ss:$44 sps:$4 sm:$0xff]   ;;  %v3687_v17 = vld [vmem:[#allocation5 + $0x9bc] ss:$44 sps:$4 sm:$0xff]  }
  0xee   :  { %2507 = vmatprep.subr.bf16.mxu0 %v3600_v18  ;;  %2589 = vmatprep.subr.bf16.mxu1 %v3603_v19  ;;  %v3682_v18 = vld [vmem:[#allocation5 + $0x9b0] ss:$44 sps:$4 sm:$0xff]   ;;  %v3685_v19 = vld [vmem:[#allocation5 + $0x9b8] ss:$44 sps:$4 sm:$0xff]  }
  0xf1   :  { %2508 = vmatpush1.bf16.msra.mxu0 %v3598_v21  ;;  %2590 = vmatpush1.bf16.msra.mxu1 %v3601_v22  ;;  %v3690_v21 = vld [vmem:[#allocation5 + $0xa0c] ss:$44 sps:$4 sm:$0xff]   ;;  %v3693_v22 = vld [vmem:[#allocation5 + $0xa14] ss:$44 sps:$4 sm:$0xff]  }
  0xf2   :  { %2509 = vmatprep.subr.bf16.mxu0 %v3606_v24  ;;  %2591 = vmatprep.subr.bf16.mxu1 %v3609_v25  ;;  %v3688_v24 = vld [vmem:[#allocation5 + $0xa08] ss:$44 sps:$4 sm:$0xff]   ;;  %v3691_v25 = vld [vmem:[#allocation5 + $0xa10] ss:$44 sps:$4 sm:$0xff]  }
  0xf5   :  { %2510 = vmatpush1.bf16.msra.mxu0 %v3604_v26  ;;  %2592 = vmatpush1.bf16.msra.mxu1 %v3607_v27  ;;  %v3696_v26 = vld [vmem:[#allocation5 + $0xa64] ss:$44 sps:$4 sm:$0xff]   ;;  %v3699_v27 = vld [vmem:[#allocation5 + $0xa6c] ss:$44 sps:$4 sm:$0xff]  }
  0xf6   :  { %2520 = vmatprep.subr.bf16.mxu0 %v3612_v28  ;;  %2602 = vmatprep.subr.bf16.mxu1 %v3615_v29  ;;  %v3694_v28 = vld [vmem:[#allocation5 + $0xa60] ss:$44 sps:$4 sm:$0xff]   ;;  %v3697_v29 = vld [vmem:[#allocation5 + $0xa68] ss:$44 sps:$4 sm:$0xff]  }
  0xf8   :  { %2512 = vmatmul.mubr.bf16.vlgmr.msra.gmra.mrb[4].mxu0 %v4006_v16  ;;  %2594 = vmatmul.mubr.bf16.vlgmr.msra.gmra.mrb[4].mxu1 %v4006_v16 }
  0xf9   :  { %2521 = vmatpush1.bf16.msra.mxu0 %v3610_v9  ;;  %2603 = vmatpush1.bf16.msra.mxu1 %v3613_v30  ;;  %v3702_v9 = vld [vmem:[#allocation5 + $0xabc] ss:$44 sps:$4 sm:$0xff]   ;;  %v3705_v30 = vld [vmem:[#allocation5 + $0xac4] ss:$44 sps:$4 sm:$0xff]  }
  0xfa   :  { %2522 = vmatprep.subr.bf16.mxu0 %v3618_v31  ;;  %2604 = vmatprep.subr.bf16.mxu1 %v3621_v32  ;;  %v3700_v31 = vld [vmem:[#allocation5 + $0xab8] ss:$44 sps:$4 sm:$0xff]   ;;  %v3703_v32 = vld [vmem:[#allocation5 + $0xac0] ss:$44 sps:$4 sm:$0xff]  }
  0xfb   :  { %2552 = vmatprep.mubr.bf16.mxu0 %v4008_v20  ;;  %2634 = vmatprep.mubr.bf16.mxu1 %v4008_v20 }
  0xfd   :  { %2523 = vmatpush1.bf16.msra.mxu0 %v3616_v33  ;;  %2605 = vmatpush1.bf16.msra.mxu1 %v3619_v34  ;;  %v3708_v33 = vld [vmem:[#allocation5 + $0x24] ss:$44 sps:$4 sm:$0xff]   ;;  %v3733_v34 = vld [vmem:[#allocation5 + $0x2e8] ss:$44 sps:$4 sm:$0xff]  }
  0xfe   :  { %2524 = vmatprep.subr.bf16.mxu0 %v3624_v35  ;;  %2606 = vmatprep.subr.bf16.mxu1 %v3627_v36  ;;  %v3706_v35 = vld [vmem:[#allocation5 + $0x20] ss:$44 sps:$4 sm:$0xff]   ;;  %v3734_v36 = vld [vmem:[#allocation5 + $0x28] ss:$44 sps:$4 sm:$0xff]  }
 0x101   :  { %2525 = vmatpush1.bf16.msra.mxu0 %v3622_v37  ;;  %2607 = vmatpush1.bf16.msra.mxu1 %v3625_v38  ;;  %v3711_v37 = vld [vmem:[#allocation5 + $0x7c] ss:$44 sps:$4 sm:$0xff]   ;;  %v3738_v38 = vld [vmem:[#allocation5 + $0x340] ss:$44 sps:$4 sm:$0xff]  }
 0x102   :  { %2526 = vmatprep.subr.bf16.mxu0 %v3630_v39  ;;  %2608 = vmatprep.subr.bf16.mxu1 %v3633_v40  ;;  %v3709_v39 = vld [vmem:[#allocation5 + $0x78] ss:$44 sps:$4 sm:$0xff]   ;;  %v3739_v40 = vld [vmem:[#allocation5 + $0x80] ss:$44 sps:$4 sm:$0xff]  }
 0x105   :  { %2527 = vmatpush1.bf16.msra.mxu0 %v3628_v41  ;;  %2609 = vmatpush1.bf16.msra.mxu1 %v3631_v42  ;;  %v3714_v41 = vld [vmem:[#allocation5 + $0xd4] ss:$44 sps:$4 sm:$0xff]   ;;  %v3743_v42 = vld [vmem:[#allocation5 + $0x398] ss:$44 sps:$4 sm:$0xff]  }
 0x106   :  { %2528 = vmatprep.subr.bf16.mxu0 %v3636_v44  ;;  %2610 = vmatprep.subr.bf16.mxu1 %v3639_v45  ;;  %v3712_v44 = vld [vmem:[#allocation5 + $0xd0] ss:$44 sps:$4 sm:$0xff]   ;;  %v3744_v45 = vld [vmem:[#allocation5 + $0xd8] ss:$44 sps:$4 sm:$0xff]  }
 0x109   :  { %2529 = vmatpush1.bf16.msra.mxu0 %v3634_v46  ;;  %2611 = vmatpush1.bf16.msra.mxu1 %v3637_v47  ;;  %v3717_v46 = vld [vmem:[#allocation5 + $0x12c] ss:$44 sps:$4 sm:$0xff]   ;;  %v3748_v47 = vld [vmem:[#allocation5 + $0x3f0] ss:$44 sps:$4 sm:$0xff]  }
 0x10a   :  { %2530 = vmatprep.subr.bf16.mxu0 %v3642_v48  ;;  %2612 = vmatprep.subr.bf16.mxu1 %v3645_v50  ;;  %v3715_v48 = vld [vmem:[#allocation5 + $0x128] ss:$44 sps:$4 sm:$0xff]   ;;  %v3749_v50 = vld [vmem:[#allocation5 + $0x130] ss:$44 sps:$4 sm:$0xff]  }
 0x10d   :  { %2531 = vmatpush1.bf16.msra.mxu0 %v3640_v51  ;;  %2613 = vmatpush1.bf16.msra.mxu1 %v3643_v52  ;;  %v3720_v51 = vld [vmem:[#allocation5 + $0x184] ss:$44 sps:$4 sm:$0xff]   ;;  %v3753_v52 = vld [vmem:[#allocation5 + $0x448] ss:$44 sps:$4 sm:$0xff]  }
 0x10e   :  { %2532 = vmatprep.subr.bf16.mxu0 %v3648_v53  ;;  %2614 = vmatprep.subr.bf16.mxu1 %v3651_v54  ;;  %v3718_v53 = vld [vmem:[#allocation5 + $0x180] ss:$44 sps:$4 sm:$0xff]   ;;  %v3723_v54 = vld [vmem:[#allocation5 + $0x1dc] ss:$44 sps:$4 sm:$0xff]  }
 0x111   :  { %2533 = vmatpush1.bf16.msra.mxu0 %v3646_v55  ;;  %2615 = vmatpush1.bf16.msra.mxu1 %v3649_v56  ;;  %v3758_v55 = vld [vmem:[#allocation5 + $0x4a0] ss:$44 sps:$4 sm:$0xff]   ;;  %v3721_v56 = vld [vmem:[#allocation5 + $0x1d8] ss:$44 sps:$4 sm:$0xff]  }
 0x112   :  { %2534 = vmatprep.subr.bf16.mxu0 %v3654_v57  ;;  %2616 = vmatprep.subr.bf16.mxu1 %v3657_v58  ;;  %v3759_v57 = vld [vmem:[#allocation5 + $0x1e0] ss:$44 sps:$4 sm:$0xff]  }
 0x113   :  { %v3726_v58 = vld [vmem:[#allocation5 + $0x234] ss:$44 sps:$4 sm:$0xff]  }
 0x115   :  { %2535 = vmatpush1.bf16.msra.mxu0 %v3652_v59  ;;  %2617 = vmatpush1.bf16.msra.mxu1 %v3655_v61  ;;  %v3763_v59 = vld [vmem:[#allocation5 + $0x4f8] ss:$44 sps:$4 sm:$0xff]   ;;  %v3724_v61 = vld [vmem:[#allocation5 + $0x230] ss:$44 sps:$4 sm:$0xff]  }
 0x116   :  { %2536 = vmatprep.subr.bf16.mxu0 %v3660_v62  ;;  %2618 = vmatprep.subr.bf16.mxu1 %v3663_v63  ;;  %v3764_v62 = vld [vmem:[#allocation5 + $0x238] ss:$44 sps:$4 sm:$0xff]  }
 0x117   :  { %v3729_v63 = vld [vmem:[#allocation5 + $0x28c] ss:$44 sps:$4 sm:$0xff]  }
 0x119   :  { %2537 = vmatpush1.bf16.msra.mxu0 %v3658_v0  ;;  %2619 = vmatpush1.bf16.msra.mxu1 %v3661_v1  ;;  %v3768_v0 = vld [vmem:[#allocation5 + $0x550] ss:$44 sps:$4 sm:$0xff]   ;;  %v3727_v1 = vld [vmem:[#allocation5 + $0x288] ss:$44 sps:$4 sm:$0xff]  }
 0x11a   :  { %2538 = vmatprep.subr.bf16.mxu0 %v3666_v2  ;;  %2620 = vmatprep.subr.bf16.mxu1 %v3669_v3  ;;  %v3769_v2 = vld [vmem:[#allocation5 + $0x290] ss:$44 sps:$4 sm:$0xff]  }
 0x11b   :  { %v3732_v3 = vld [vmem:[#allocation5 + $0x2e4] ss:$44 sps:$4 sm:$0xff]  }
 0x11d   :  { %2539 = vmatpush1.bf16.msra.mxu0 %v3664_v4  ;;  %2621 = vmatpush1.bf16.msra.mxu1 %v3667_v5  ;;  %v3773_v4 = vld [vmem:[#allocation5 + $0x868] ss:$44 sps:$4 sm:$0xff]   ;;  %v3730_v5 = vld [vmem:[#allocation5 + $0x2e0] ss:$44 sps:$4 sm:$0xff]  }
 0x11e   :  { %2540 = vmatprep.subr.bf16.mxu0 %v3672_v6  ;;  %2622 = vmatprep.subr.bf16.mxu1 %v3675_v7  ;;  %v3774_v6 = vld [vmem:[#allocation5 + $0x5a8] ss:$44 sps:$4 sm:$0xff]  }
 0x11f   :  { %v3737_v7 = vld [vmem:[#allocation5 + $0x33c] ss:$44 sps:$4 sm:$0xff]  }
 0x121   :  { %2541 = vmatpush1.bf16.msra.mxu0 %v3670_v8  ;;  %2623 = vmatpush1.bf16.msra.mxu1 %v3673_v10  ;;  %v3778_v8 = vld [vmem:[#allocation5 + $0x8c0] ss:$44 sps:$4 sm:$0xff]   ;;  %v3735_v10 = vld [vmem:[#allocation5 + $0x338] ss:$44 sps:$4 sm:$0xff]  }
 0x122   :  { %2542 = vmatprep.subr.bf16.mxu0 %v3678_v11  ;;  %2624 = vmatprep.subr.bf16.mxu1 %v3681_v12  ;;  %v3779_v11 = vld [vmem:[#allocation5 + $0x600] ss:$44 sps:$4 sm:$0xff]  }
 0x123   :  { %v3742_v12 = vld [vmem:[#allocation5 + $0x394] ss:$44 sps:$4 sm:$0xff]  }
 0x125   :  { %2543 = vmatpush1.bf16.msra.mxu0 %v3676_v13  ;;  %2625 = vmatpush1.bf16.msra.mxu1 %v3679_v14  ;;  %v3783_v13 = vld [vmem:[#allocation5 + $0x918] ss:$44 sps:$4 sm:$0xff]   ;;  %v3740_v14 = vld [vmem:[#allocation5 + $0x390] ss:$44 sps:$4 sm:$0xff]  }
 0x126   :  { %2544 = vmatprep.subr.bf16.mxu0 %v3684_v15  ;;  %2626 = vmatprep.subr.bf16.mxu1 %v3687_v17  ;;  %v3784_v15 = vld [vmem:[#allocation5 + $0x658] ss:$44 sps:$4 sm:$0xff]  }
 0x127   :  { %v3747_v17 = vld [vmem:[#allocation5 + $0x3ec] ss:$44 sps:$4 sm:$0xff]  }
 0x129   :  { %2545 = vmatpush1.bf16.msra.mxu0 %v3682_v18  ;;  %2627 = vmatpush1.bf16.msra.mxu1 %v3685_v19  ;;  %v3788_v18 = vld [vmem:[#allocation5 + $0x970] ss:$44 sps:$4 sm:$0xff]   ;;  %v3745_v19 = vld [vmem:[#allocation5 + $0x3e8] ss:$44 sps:$4 sm:$0xff]  }
 0x12a   :  { %2546 = vmatprep.subr.bf16.mxu0 %v3690_v21  ;;  %2628 = vmatprep.subr.bf16.mxu1 %v3693_v22  ;;  %v3789_v21 = vld [vmem:[#allocation5 + $0x6b0] ss:$44 sps:$4 sm:$0xff]  }
 0x12b   :  { %v3752_v22 = vld [vmem:[#allocation5 + $0x444] ss:$44 sps:$4 sm:$0xff]  }
 0x12d   :  { %2547 = vmatpush1.bf16.msra.mxu0 %v3688_v24  ;;  %2629 = vmatpush1.bf16.msra.mxu1 %v3691_v25  ;;  %v3793_v24 = vld [vmem:[#allocation5 + $0x9c8] ss:$44 sps:$4 sm:$0xff]   ;;  %v3750_v25 = vld [vmem:[#allocation5 + $0x440] ss:$44 sps:$4 sm:$0xff]  }
 0x12e   :  { %2548 = vmatprep.subr.bf16.mxu0 %v3696_v26  ;;  %2630 = vmatprep.subr.bf16.mxu1 %v3699_v27  ;;  %v3794_v26 = vld [vmem:[#allocation5 + $0x708] ss:$44 sps:$4 sm:$0xff]  }
 0x12f   :  { %v3757_v27 = vld [vmem:[#allocation5 + $0x49c] ss:$44 sps:$4 sm:$0xff]  }
 0x131   :  { %2549 = vmatpush1.bf16.msra.mxu0 %v3694_v28  ;;  %2631 = vmatpush1.bf16.msra.mxu1 %v3697_v29  ;;  %v3798_v28 = vld [vmem:[#allocation5 + $0xa20] ss:$44 sps:$4 sm:$0xff]   ;;  %v3755_v29 = vld [vmem:[#allocation5 + $0x498] ss:$44 sps:$4 sm:$0xff]  }
 0x132   :  { %2550 = vmatprep.subr.bf16.mxu0 %v3702_v9  ;;  %2632 = vmatprep.subr.bf16.mxu1 %v3705_v30  ;;  %v3799_v9 = vld [vmem:[#allocation5 + $0x760] ss:$44 sps:$4 sm:$0xff]  }
 0x133   :  { %v3762_v30 = vld [vmem:[#allocation5 + $0x4f4] ss:$44 sps:$4 sm:$0xff]  }
 0x135   :  { %2551 = vmatpush1.bf16.msra.mxu0 %v3700_v31  ;;  %2633 = vmatpush1.bf16.msra.mxu1 %v3703_v32  ;;  %v3803_v31 = vld [vmem:[#allocation5 + $0xa78] ss:$44 sps:$4 sm:$0xff]   ;;  %v3760_v32 = vld [vmem:[#allocation5 + $0x4f0] ss:$44 sps:$4 sm:$0xff]  }
 0x136   :  { %2643 = vmatprep.subr.bf16.mxu0 %v3708_v33  ;;  %3240 = vmatprep.subr.bf16.mxu1 %v3733_v34  ;;  %v3804_v33 = vld [vmem:[#allocation5 + $0x7b8] ss:$44 sps:$4 sm:$0xff]  }
 0x137   :  { %v3767_v34 = vld [vmem:[#allocation5 + $0x54c] ss:$44 sps:$4 sm:$0xff]  }
 0x138   :  { %2553 = vmatmul.mubr.bf16.vlgmr.msra.gmra.mrb[4].mxu0 %v4016_v23  ;;  %2635 = vmatmul.mubr.bf16.vlgmr.msra.gmra.mrb[4].mxu1 %v4016_v23 }
 0x139   :  { %2644 = vmatpush1.bf16.msra.mxu0 %v3706_v35  ;;  %3241 = vmatpush3.bf16.msra.mxu1 %v3734_v36  ;;  %v3808_v35 = vld [vmem:[#allocation5 + $0xad0] ss:$44 sps:$4 sm:$0xff]   ;;  %v3765_v36 = vld [vmem:[#allocation5 + $0x548] ss:$44 sps:$4 sm:$0xff]  }
 0x13a   :  { %2645 = vmatprep.subr.bf16.mxu0 %v3711_v37  ;;  %3242 = vmatprep.subr.bf16.mxu1 %v3738_v38  ;;  %v3809_v37 = vld [vmem:[#allocation5 + $0x810] ss:$44 sps:$4 sm:$0xff]  }
 0x13b   :  { %2675 = vmatprep.mubr.bf16.mxu0 %v3997_v60  ;;  %2757 = vmatprep.mubr.bf16.mxu1 %v3997_v60  ;;  %v3754_v60 = vld [vmem:[#allocation5 + $0x188] ss:$44 sps:$4 sm:$0xff]   ;;  %v3772_v38 = vld [vmem:[#allocation5 + $0x5a4] ss:$44 sps:$4 sm:$0xff]  }
 0x13d   :  { %2646 = vmatpush1.bf16.msra.mxu0 %v3709_v39  ;;  %3243 = vmatpush3.bf16.msra.mxu1 %v3739_v40  ;;  %v3770_v39 = vld [vmem:[#allocation5 + $0x5a0] ss:$44 sps:$4 sm:$0xff]   ;;  %v3777_v40 = vld [vmem:[#allocation5 + $0x5fc] ss:$44 sps:$4 sm:$0xff]  }
 0x13e   :  { %2647 = vmatprep.subr.bf16.mxu0 %v3714_v41  ;;  %3244 = vmatprep.subr.bf16.mxu1 %v3743_v42  ;;  %v3775_v41 = vld [vmem:[#allocation5 + $0x5f8] ss:$44 sps:$4 sm:$0xff]   ;;  %v3782_v42 = vld [vmem:[#allocation5 + $0x654] ss:$44 sps:$4 sm:$0xff]  }
 0x141   :  { %2648 = vmatpush1.bf16.msra.mxu0 %v3712_v44  ;;  %3245 = vmatpush3.bf16.msra.mxu1 %v3744_v45  ;;  %v3780_v44 = vld [vmem:[#allocation5 + $0x650] ss:$44 sps:$4 sm:$0xff]   ;;  %v3787_v45 = vld [vmem:[#allocation5 + $0x6ac] ss:$44 sps:$4 sm:$0xff]  }
 0x142   :  { %2649 = vmatprep.subr.bf16.mxu0 %v3717_v46  ;;  %3246 = vmatprep.subr.bf16.mxu1 %v3748_v47  ;;  %v3785_v46 = vld [vmem:[#allocation5 + $0x6a8] ss:$44 sps:$4 sm:$0xff]   ;;  %v3792_v47 = vld [vmem:[#allocation5 + $0x704] ss:$44 sps:$4 sm:$0xff]  }
 0x145   :  { %2650 = vmatpush1.bf16.msra.mxu0 %v3715_v48  ;;  %3247 = vmatpush3.bf16.msra.mxu1 %v3749_v50  ;;  %v470_v48 = vsub.s32 0, %v3991_v43  ;;  %v3790_v50 = vld [vmem:[#allocation5 + $0x700] ss:$44 sps:$4 sm:$0xff]  }
 0x146   :  { %2651 = vmatprep.subr.bf16.mxu0 %v3720_v51  ;;  %3248 = vmatprep.subr.bf16.mxu1 %v3753_v52  ;;  %v4037_v51 = vld [vmem:[#allocation7] sm:$0xff]  ;;  %v482_v52 = vsub.s32 3, %v3991_v43 }
 0x149   :  { %2652 = vmatpush1.bf16.msra.mxu0 %v3718_v53  ;;  %3249 = vmatpush3.bf16.msra.mxu1 %v3754_v60  ;;  %v3797_v53 = vld [vmem:[#allocation5 + $0x75c] ss:$44 sps:$4 sm:$0xff]   ;;  %v471_v60 = vrot.slane %v4037_v51, %v470_v48 }
 0x14a   :  { %2653 = vmatprep.subr.bf16.mxu0 %v3723_v54  ;;  %3250 = vmatprep.subr.bf16.mxu1 %v3758_v55 }
 0x14d   :  { %2654 = vmatpush1.bf16.msra.mxu0 %v3721_v56  ;;  %3251 = vmatpush3.bf16.msra.mxu1 %v3759_v57  ;;  %v483_v56 = vrot.slane %v4037_v51, %v482_v52  ;;  %v3795_v57 = vld [vmem:[#allocation5 + $0x758] ss:$44 sps:$4 sm:$0xff]  }
 0x14e   :  { %2655 = vmatprep.subr.bf16.mxu0 %v3726_v58  ;;  %3252 = vmatprep.subr.bf16.mxu1 %v3763_v59  ;;  %v3802_v58 = vld [vmem:[#allocation5 + $0x7b4] ss:$44 sps:$4 sm:$0xff]  }
 0x151   :  { %2656 = vmatpush1.bf16.msra.mxu0 %v3724_v61  ;;  %3253 = vmatpush3.bf16.msra.mxu1 %v3764_v62 }
 0x152   :  { %2657 = vmatprep.subr.bf16.mxu0 %v3729_v63  ;;  %3254 = vmatprep.subr.bf16.mxu1 %v3768_v0 }
 0x155   :  { %2658 = vmatpush1.bf16.msra.mxu0 %v3727_v1  ;;  %3255 = vmatpush3.bf16.msra.mxu1 %v3769_v2 }
 0x156   :  { %2659 = vmatprep.subr.bf16.mxu0 %v3732_v3  ;;  %3262 = vmatprep.subr.bf16.mxu1 %v3773_v4 }
 0x158   :  { %2758 = vmatmul.mubr.bf16.vlgmr.msra.gmra.mrb[8].mxu1 %v4006_v16 }
 0x159   :  { %2660 = vmatpush1.bf16.msra.mxu0 %v3730_v5  ;;  %3263 = vmatpush3.bf16.msra.mxu1 %v3774_v6  ;;  %v3800_v6 = vld [vmem:[#allocation5 + $0x7b0] ss:$44 sps:$4 sm:$0xff]  }
 0x15a   :  { %2661 = vmatprep.subr.bf16.mxu0 %v3737_v7  ;;  %3264 = vmatprep.subr.bf16.mxu1 %v3778_v8 }
 0x15b   :  { %2797 = vmatprep.mubr.bf16.mxu1 %v4008_v20 }
 0x15d   :  { %2662 = vmatpush1.bf16.msra.mxu0 %v3735_v10  ;;  %3265 = vmatpush3.bf16.msra.mxu1 %v3779_v11  ;;  %v3807_v10 = vld [vmem:[#allocation5 + $0x80c] ss:$44 sps:$4 sm:$0xff]  }
 0x15e   :  { %2663 = vmatprep.subr.bf16.mxu0 %v3742_v12  ;;  %3266 = vmatprep.subr.bf16.mxu1 %v3783_v13 }
 0x161   :  { %2664 = vmatpush1.bf16.msra.mxu0 %v3740_v14  ;;  %3267 = vmatpush3.bf16.msra.mxu1 %v3784_v15  ;;  %v3805_v15 = vld [vmem:[#allocation5 + $0x808] ss:$44 sps:$4 sm:$0xff]  }
 0x162   :  { %2665 = vmatprep.subr.bf16.mxu0 %v3747_v17  ;;  %3268 = vmatprep.subr.bf16.mxu1 %v3788_v18  ;;  %v3812_v17 = vld [vmem:[#allocation5 + $0x864] ss:$44 sps:$4 sm:$0xff]  }
 0x165   :  { %2666 = vmatpush1.bf16.msra.mxu0 %v3745_v19  ;;  %3269 = vmatpush3.bf16.msra.mxu1 %v3789_v21  ;;  %v3810_v19 = vld [vmem:[#allocation5 + $0x860] ss:$44 sps:$4 sm:$0xff]   ;;  %v3815_v21 = vld [vmem:[#allocation5 + $0x8bc] ss:$44 sps:$4 sm:$0xff]  }
 0x166   :  { %2667 = vmatprep.subr.bf16.mxu0 %v3752_v22  ;;  %3270 = vmatprep.subr.bf16.mxu1 %v3793_v24  ;;  %v3813_v22 = vld [vmem:[#allocation5 + $0x8b8] ss:$44 sps:$4 sm:$0xff]   ;;  %v3818_v24 = vld [vmem:[#allocation5 + $0x914] ss:$44 sps:$4 sm:$0xff]  }
 0x169   :  { %2668 = vmatpush1.bf16.msra.mxu0 %v3750_v25  ;;  %3271 = vmatpush3.bf16.msra.mxu1 %v3794_v26  ;;  %v3816_v25 = vld [vmem:[#allocation5 + $0x910] ss:$44 sps:$4 sm:$0xff]   ;;  %v3821_v26 = vld [vmem:[#allocation5 + $0x96c] ss:$44 sps:$4 sm:$0xff]  }
 0x16a   :  { %2669 = vmatprep.subr.bf16.mxu0 %v3757_v27  ;;  %3272 = vmatprep.subr.bf16.mxu1 %v3798_v28  ;;  %v3819_v27 = vld [vmem:[#allocation5 + $0x968] ss:$44 sps:$4 sm:$0xff]   ;;  %v3824_v28 = vld [vmem:[#allocation5 + $0x9c4] ss:$44 sps:$4 sm:$0xff]  }
 0x16d   :  { %2670 = vmatpush1.bf16.msra.mxu0 %v3755_v29  ;;  %3273 = vmatpush3.bf16.msra.mxu1 %v3799_v9  ;;  %v3822_v29 = vld [vmem:[#allocation5 + $0x9c0] ss:$44 sps:$4 sm:$0xff]   ;;  %v3827_v9 = vld [vmem:[#allocation5 + $0xa1c] ss:$44 sps:$4 sm:$0xff]  }
 0x16e   :  { %2671 = vmatprep.subr.bf16.mxu0 %v3762_v30  ;;  %3274 = vmatprep.subr.bf16.mxu1 %v3803_v31  ;;  %v3825_v30 = vld [vmem:[#allocation5 + $0xa18] ss:$44 sps:$4 sm:$0xff]   ;;  %v3830_v31 = vld [vmem:[#allocation5 + $0xa74] ss:$44 sps:$4 sm:$0xff]  }
 0x171   :  { %2672 = vmatpush1.bf16.msra.mxu0 %v3760_v32  ;;  %3275 = vmatpush3.bf16.msra.mxu1 %v3804_v33  ;;  %v3828_v32 = vld [vmem:[#allocation5 + $0xa70] ss:$44 sps:$4 sm:$0xff]   ;;  %v3833_v33 = vld [vmem:[#allocation5 + $0xacc] ss:$44 sps:$4 sm:$0xff]  }
 0x172   :  { %2673 = vmatprep.subr.bf16.mxu0 %v3767_v34  ;;  %3276 = vmatprep.subr.bf16.mxu1 %v3808_v35  ;;  %v3831_v34 = vld [vmem:[#allocation5 + $0xac8] ss:$44 sps:$4 sm:$0xff]   ;;  %v486_v35 = vsub.s32 4, %v3991_v43 }
 0x175   :  { %2674 = vmatpush1.bf16.msra.mxu0 %v3765_v36  ;;  %3277 = vmatpush3.bf16.msra.mxu1 %v3809_v37  ;;  %v494_v36 = vsub.s32 6, %v3991_v43  ;;  %v490_v37 = vsub.s32 5, %v3991_v43 }
 0x176   :  { %2684 = vmatprep.subr.bf16.mxu0 %v3772_v38  ;;  %v498_v38 = vsub.s32 7, %v3991_v43 }
 0x178   :  { %2676 = vmatmul.mubr.bf16.vlgmr.msra.gmra.mrb[8].mxu0 %v4006_v16  ;;  %2798 = vmatmul.mubr.bf16.vlgmr.msra.gmra.mrb[12].mxu1 %v4016_v23  ;;  %v478_v16 = vsub.s32 2, %v3991_v43 }
 0x179   :  { %2685 = vmatpush1.bf16.msra.mxu0 %v3770_v39  ;;  %2716 = vmatprep.mubr.bf16.mxu0 %v4008_v20  ;;  %v474_v20 = vsub.s32 1, %v3991_v43  ;;  %v487_v39 = vrot.slane %v4037_v51, %v486_v35 }
 0x17a   :  { %2686 = vmatprep.subr.bf16.mxu0 %v3777_v40  ;;  %v479_v54 = vrot.slane %v4037_v51, %v478_v16  ;;  %v495_v40 = vrot.slane %v4037_v51, %v494_v36 }
 0x17b   :  { %v475_v55 = vrot.slane %v4037_v51, %v474_v20 }
 0x17d   :  { %2687 = vmatpush1.bf16.msra.mxu0 %v3775_v41  ;;  %v491_v41 = vrot.slane %v4037_v51, %v490_v37 }
 0x17e   :  { %2688 = vmatprep.subr.bf16.mxu0 %v3782_v42  ;;  %v499_v42 = vrot.slane %v4037_v51, %v498_v38 }
 0x181   :  { %2689 = vmatpush1.bf16.msra.mxu0 %v3780_v44 }
 0x182   :  { %2690 = vmatprep.subr.bf16.mxu0 %v3787_v45 }
 0x185   :  { %2691 = vmatpush1.bf16.msra.mxu0 %v3785_v46 }
 0x186   :  { %2692 = vmatprep.subr.bf16.mxu0 %v3792_v47 }
 0x189   :  { %2693 = vmatpush1.bf16.msra.mxu0 %v3790_v50 }
 0x18a   :  { %2694 = vmatprep.subr.bf16.mxu0 %v3797_v53 }
 0x18b   :  { %v2390_v59 = vpop.f32.mrb[0].mxu0  ;;  %v2472_v61 = vpop.f32.mrb[0].mxu1 }
 0x18c   :  { %v3284_v62 = vadd.f32 %v2390_v59, %v471_v60  ;;  %v3286_v63 = vadd.f32 %v2472_v61, %v479_v54  ;;  %v2392_v0 = vpop.f32.mrb[1].mxu0  ;;  %v2474_v1 = vpop.f32.mrb[1].mxu1 }
 0x18d   :  { %v3285_v2 = vadd.f32 %v2392_v0, %v475_v55  ;;  %v3287_v3 = vadd.f32 %v2474_v1, %v483_v56  ;;  %v2394_v4 = vpop.f32.mrb[2].mxu0  ;;  %v2476_v5 = vpop.f32.mrb[2].mxu1  ;;  %2695 = vmatpush1.bf16.msra.mxu0 %v3795_v57 }
 0x18e   :  { %v2395_v7 = vpop.f32.mrb[3].mxu0  ;;  %v2477_v8 = vpop.f32.mrb[3].mxu1  ;;  %2696 = vmatprep.subr.bf16.mxu0 %v3802_v58 }
 0x18f   :  { %v2816_v11 = vcombine.low %v3284_v62, %v3285_v2  ;;  %v2817_v12 = vcombine.low %v3286_v63, %v3287_v3  ;;  %v465_v3 = vld [vmem:[#allocation7 + $0x8] sm:$0x7] }
 0x190   :  { %v511_v4 = vrot.slane %v465_v3, %v478_v16 }
 0x191   :  { %v2824_v13 = vrot.slane %v2816_v11, %v3994_v49  ;;  %v2831_v14 = vrot.slane %v2817_v12, %v3994_v49  ;;  %2697 = vmatpush1.bf16.msra.mxu0 %v3800_v6 }
 0x192   :  { %2698 = vmatprep.subr.bf16.mxu0 %v3807_v10 }
 0x193   :  { %v2832_v18 = vcombine.low %v2824_v13, %v2831_v14  ;;  %v503_v13 = vrot.slane %v465_v3, %v470_v48  ;;  %v507_v14 = vrot.slane %v465_v3, %v474_v20 }
 0x195   :  { %2869 = vst [vmem:[#allocation8] sm:$0xff] %v2832_v18  ;;  %2699 = vmatpush1.bf16.msra.mxu0 %v3805_v15 }
 0x196   :  { %2700 = vmatprep.subr.bf16.mxu0 %v3812_v17 }
 0x199   :  { %2701 = vmatpush1.bf16.msra.mxu0 %v3810_v19 }
 0x19a   :  { %2702 = vmatprep.subr.bf16.mxu0 %v3815_v21 }
 0x19d   :  { %2703 = vmatpush1.bf16.msra.mxu0 %v3813_v22 }
 0x19e   :  { %2704 = vmatprep.subr.bf16.mxu0 %v3818_v24 }
 0x1a1   :  { %2705 = vmatpush1.bf16.msra.mxu0 %v3816_v25 }
 0x1a2   :  { %2706 = vmatprep.subr.bf16.mxu0 %v3821_v26 }
 0x1a5   :  { %2707 = vmatpush1.bf16.msra.mxu0 %v3819_v27 }
 0x1a6   :  { %2708 = vmatprep.subr.bf16.mxu0 %v3824_v28 }
 0x1a9   :  { %2709 = vmatpush1.bf16.msra.mxu0 %v3822_v29 }
 0x1aa   :  { %2710 = vmatprep.subr.bf16.mxu0 %v3827_v9 }
 0x1ad   :  { %2711 = vmatpush1.bf16.msra.mxu0 %v3825_v30 }
 0x1ae   :  { %2712 = vmatprep.subr.bf16.mxu0 %v3830_v31 }
 0x1b1   :  { %2713 = vmatpush1.bf16.msra.mxu0 %v3828_v32 }
 0x1b2   :  { %2714 = vmatprep.subr.bf16.mxu0 %v3833_v33 }
 0x1b5   :  { %2715 = vmatpush1.bf16.msra.mxu0 %v3831_v34 }
 0x1b8   :  { %2717 = vmatmul.mubr.bf16.vlgmr.msra.gmra.mrb[8].mxu0 %v4016_v23 }
 0x20b   :  { %v2554_v44 = vpop.f32.mrb[4].mxu0  ;;  %v2636_v45 = vpop.f32.mrb[4].mxu1 }
 0x20c   :  { %v3288_v46 = vadd.f32 %v2554_v44, %v487_v39  ;;  %v3290_v23 = vadd.f32 %v2636_v45, %v495_v40  ;;  %v2556_v47 = vpop.f32.mrb[5].mxu0  ;;  %v2638_v50 = vpop.f32.mrb[5].mxu1 }
 0x20d   :  { %v3289_v52 = vadd.f32 %v2556_v47, %v491_v41  ;;  %v3291_v53 = vadd.f32 %v2638_v50, %v499_v42  ;;  %v2558_v60 = vpop.f32.mrb[6].mxu0  ;;  %v2640_v54 = vpop.f32.mrb[6].mxu1 }
 0x20e   :  { %v2559_v55 = vpop.f32.mrb[7].mxu0  ;;  %v2641_v56 = vpop.f32.mrb[7].mxu1 }
 0x20f   :  { %v2833_v57 = vcombine.low %v3288_v46, %v3289_v52  ;;  %v2834_v58 = vcombine.low %v3290_v23, %v3291_v53 }
 0x211   :  { %v2841_v59 = vrot.slane %v2833_v57, %v3994_v49  ;;  %v2848_v61 = vrot.slane %v2834_v58, %v3994_v49 }
 0x213   :  { %v2849_v62 = vcombine.low %v2841_v59, %v2848_v61 }
 0x215   :  { %2870 = vst [vmem:[#allocation8 + $0x8] sm:$0xff] %v2849_v62 }
 0x22b   :  { %v3256_v51 = vpop.f32.mrb[8].mxu1 }
 0x22c   :  { %v3257_v63 = vpop.f32.mrb[9].mxu1 }
 0x22d   :  { %v3258_v0 = vadd.f32 %v3257_v63, %v3256_v51  ;;  %v3259_v1 = vpop.f32.mrb[10].mxu1 }
 0x22e   :  { %v3260_v2 = vpop.f32.mrb[11].mxu1 }
 0x22f   :  { %v2760_v5 = vadd.f32 %v3258_v0, %v511_v4 }
 0x24b   :  { %v3278_v6 = vpop.f32.mrb[12].mxu1 }
 0x24c   :  { %v3279_v7 = vpop.f32.mrb[13].mxu1 }
 0x24d   :  { %v3280_v8 = vadd.f32 %v3279_v7, %v3278_v6  ;;  %v3281_v10 = vpop.f32.mrb[14].mxu1 }
 0x24e   :  { %v3282_v11 = vpop.f32.mrb[15].mxu1 }
 0x24f   :  { %v2800_v12 = vadd.f32 %v3280_v8, %v2760_v5 }
 0x251   :  { %v2864_v24 = vrot.slane %v2800_v12, %v3994_v49 }
 0x28b   :  { %v2718_v15 = vpop.f32.mrb[8].mxu0 }
 0x28c   :  { %v3292_v17 = vadd.f32 %v2718_v15, %v503_v13  ;;  %v2720_v18 = vpop.f32.mrb[9].mxu0 }
 0x28d   :  { %v3293_v19 = vadd.f32 %v2720_v18, %v507_v14  ;;  %v2722_v21 = vpop.f32.mrb[10].mxu0 }
 0x28e   :  { %v2723_v22 = vpop.f32.mrb[11].mxu0 }
 0x28f   :  { %v2850_v16 = vcombine.low %v3292_v17, %v3293_v19 }
 0x291   :  { %v2857_v25 = vrot.slane %v2850_v16, %v3994_v49 }
 0x293   :  { %v2865_v26 = vcombine.low %v2857_v25, %v2864_v24 }
 0x295   :  { %2871 = vst [vmem:[#allocation8 + $0x10] sm:$0x3f] %v2865_v26 }
 0x296   :  { %3911 = shalt.err (!%p3908_p0)
}
 0x297   :  { %s3912_s26 = scalar_lea.hbm %s4087_s3, 352 }
 0x298   :  { %p3913_p1 = scmp.ne.s32.totalorder %s4087_s3, %s3912_s26  ;;  %p3916_p2 = scmp.lt.u32.totalorder %s3912_s26, %s4087_s3 }
 0x29a   :  { %p3918_p3 = pnand %p3916_p2, %p3913_p1 }
 0x29c   :  { %3921 = shalt.err (!%p3918_p3)
}
 0x29d   :  { %2881 = dma.vmem_to_hbm [thread:$0]  %s2879_s22, 352, %s4087_s3, [#allocation4]  }
 0x29e   :  { %3926 = dma.done.wait [#allocation4], 352  }
 0x29f   :  { %3927 = vsyncadd [#allocation4], 4294966944 }
 0x2a0   :  { %2885 = vsyncpa [#allocation3], 1 }
 0x2a1   :  { %2886 = vsyncpa [#allocation6], 1 }
 0x2a2   :  { %2887 = vsyncpa [#allocation4], 1 }

</bundles_post_ra>
